<compile_context>
chip_gen: v5e
topology: v5e:2x2
jax: 0.10.0
libtpu: 0.0.40
codegen_flags: <defaults>
</compile_context>

<pallas_src>
import jax
import jax.numpy as jnp
import numpy as np
from jax import lax
from jax.experimental import pallas as pl
from jax.experimental.pallas import tpu as pltpu


def _round_up(x, m):
    return (x + m - 1) // m * m


# ----------------------------------------------------------------------------
# Fused kernel: LSTM recurrence (time-chunked) + hiddenTotag + log_softmax.
# ----------------------------------------------------------------------------
def _lstm_tag_kernel(len_ref, gx_ref, whh_ref, wtag_ref, btag_ref,
                     out_ref, h_ref, c_ref):
    """Grid = (batch_tiles [parallel], time_chunks [arbitrary]).

      len_ref:  (Bt, 1)      int32  sequence lengths (0 for padded batch rows)
      gx_ref:   (Tc, Bt, 4H) f32    x@W_ih + (b_ih+b_hh), this time chunk
      whh_ref:  (H, 4H)      f32    recurrent weights (PyTorch i|f|g|o order)
      wtag_ref: (H, Kp)      f32    hiddenTotag weights, cols padded with 0
      btag_ref: (1, Kp)      f32    hiddenTotag bias,   cols padded with -1e30
      out_ref:  (Tc, Bt, Kp) f32    log_softmax(tag logits), time-major
      h_ref/c_ref: (Bt, H)   f32    scratch carried across time chunks
    """
    Tc, Bt, G = gx_ref.shape
    H = whh_ref.shape[0]
    ti = pl.program_id(1)

    @pl.when(ti == 0)
    def _():                                      # new batch tile -> zero state
        h_ref[...] = jnp.zeros_like(h_ref)
        c_ref[...] = jnp.zeros_like(c_ref)

    # Hoisted once per chunk (avoid per-iteration broadcast_in_dim / reloads).
    w_hh = whh_ref[...]
    w_tag = wtag_ref[...]
    b_tag = btag_ref[...]
    len_bh = jnp.broadcast_to(len_ref[...], (Bt, H))          # (Bt, H) int32
    t0 = ti * Tc

    def step(t, carry):
        h, c = carry
        # One fused (Bt,H) @ (H,4H) MXU push instead of 4 per-gate matmuls.
        gates = gx_ref[t] + jnp.dot(h, w_hh,
                                    preferred_element_type=jnp.float32)
        i_g = jax.nn.sigmoid(gates[:, 0 * H:1 * H])
        f_g = jax.nn.sigmoid(gates[:, 1 * H:2 * H])
        g_g = jnp.tanh(gates[:, 2 * H:3 * H])
        o_g = jax.nn.sigmoid(gates[:, 3 * H:4 * H])

        c_new = f_g * c + i_g * g_g
        h_new = o_g * jnp.tanh(c_new)

        valid = (t0 + t) < len_bh                              # (Bt, H) bool
        # pad_packed_sequence zero-pads the unpacked output; padded timesteps
        # do not advance h/c (pack_padded_sequence semantics).
        h_out = jnp.where(valid, h_new, 0.0)

        # Fused hiddenTotag + log_softmax (padded cols: weight 0, bias -1e30,
        # so max/logsumexp over the 128 lanes equal the K-column result).
        logits = jnp.dot(h_out, w_tag,
                         preferred_element_type=jnp.float32) + b_tag
        mx = jnp.max(logits, axis=-1, keepdims=True)
        shifted = logits - mx
        lse = jnp.log(jnp.sum(jnp.exp(shifted), axis=-1, keepdims=True))
        out_ref[t] = shifted - lse                             # (Bt, Kp) dense

        h = jnp.where(valid, h_new, h)
        c = jnp.where(valid, c_new, c)
        return h, c

    h_fin, c_fin = lax.fori_loop(0, Tc, step, (h_ref[...], c_ref[...]),
                                 unroll=min(8, Tc))
    h_ref[...] = h_fin
    c_ref[...] = c_fin


# ----------------------------------------------------------------------------
# Wrapper mirroring RNN_Labeler.forward.
# ----------------------------------------------------------------------------
def rnn_labeler_forward(batch_seqs, seqs_len, params, tagprob=False,
                        time_chunk=128):
    """Args:
      batch_seqs: (B, T, D) float32, batch-first like the PyTorch module.
      seqs_len:   sequence of ints (pack_padded_sequence lengths).
      params:     dict with 'w_ih' (D,4H), 'w_hh' (H,4H), 'b' (1,4H),
                  'w_tag' (H,K), 'b_tag' (1,K)   (PyTorch gate order i,f,g,o).
      tagprob:    also return softmax probabilities if True.

    Returns:
      (tag_scores (B*T_max, K) log-softmax, tag_prob or None)
    """
    seqs_len = np.asarray(seqs_len)
    max_len = int(seqs_len.max())                    # pad_packed_sequence length
    x = jnp.asarray(batch_seqs, jnp.float32)[:, :max_len]
    B, T, D = x.shape
    H = params["w_hh"].shape[0]
    G = 4 * H
    K = params["w_tag"].shape[1]
    Kp = _round_up(K, 128)

    # (1) Hoisted input projection, kept time-major & lane-dense: (T, B, 4H).
    x_tm = jnp.transpose(x, (1, 0, 2)).reshape(T * B, D)
    gates_x = (x_tm @ params["w_ih"] + params["b"]).reshape(T, B, G)

    # (2) Tiling: 2 batch tiles when B is large (v7x has 2 TensorCores),
    #     time streamed in chunks so VMEM stays O(chunk) with DMA overlap.
    if B <= 8:
        B_pad, n_b = B, 1
    else:
        B_pad, n_b = _round_up(B, 16), 2
    Bt = B_pad // n_b
    Tc = min(time_chunk, _round_up(T, 8))
    T_pad = _round_up(T, Tc)
    n_t = T_pad // Tc

    if T_pad != T or B_pad != B:
        gates_x = jnp.pad(gates_x, ((0, T_pad - T), (0, B_pad - B), (0, 0)))

    lengths = jnp.zeros((B_pad, 1), jnp.int32)
    lengths = lengths.at[:B, 0].set(jnp.asarray(seqs_len, jnp.int32))

    # Lane-dense tag weights: pad K -> Kp with zero weights and a very negative
    # bias so padded logits never perturb max / logsumexp.
    w_tag_p = jnp.zeros((H, Kp), jnp.float32).at[:, :K].set(params["w_tag"])
    b_tag_p = jnp.full((1, Kp), -1e30, jnp.float32).at[:, :K].set(params["b_tag"])

    out = pl.pallas_call(
        _lstm_tag_kernel,
        out_shape=jax.ShapeDtypeStruct((T_pad, B_pad, Kp), jnp.float32),
        grid=(n_b, n_t),
        in_specs=[
            pl.BlockSpec((Bt, 1), lambda bi, ti: (bi, 0)),          # lengths
            pl.BlockSpec((Tc, Bt, G), lambda bi, ti: (ti, bi, 0)),  # gates_x
            pl.BlockSpec((H, G), lambda bi, ti: (0, 0)),            # W_hh
            pl.BlockSpec((H, Kp), lambda bi, ti: (0, 0)),           # W_tag
            pl.BlockSpec((1, Kp), lambda bi, ti: (0, 0)),           # b_tag
        ],
        out_specs=pl.BlockSpec((Tc, Bt, Kp), lambda bi, ti: (ti, bi, 0)),
        scratch_shapes=[pltpu.VMEM((Bt, H), jnp.float32),   # h carry
                        pltpu.VMEM((Bt, H), jnp.float32)],  # c carry
        compiler_params=pltpu.CompilerParams(
            dimension_semantics=("parallel", "arbitrary"),
            vmem_limit_bytes=32 * 1024 * 1024),
    )(lengths, gates_x, params["w_hh"], w_tag_p, b_tag_p)

    # (3) Drop padding, slice the K real columns BEFORE reordering (so the
    #     batch-first reorder touches a tiny K-wide array), then flatten like
    #     `.view(-1, tagset_size)`.
    tag_scores = jnp.transpose(out[:T, :B, :K], (1, 0, 2)).reshape(B * T, K)

    # (4) softmax probs only when requested.
    tag_prob = jnp.exp(tag_scores) if tagprob else None
    return tag_scores, tag_prob


# ----------------------------------------------------------------------------
# Pure-JAX reference (same math, no Pallas) for a correctness check.
# ----------------------------------------------------------------------------
def ref_forward(batch_seqs, seqs_len, params):
    seqs_len = np.asarray(seqs_len)
    max_len = int(seqs_len.max())
    x = jnp.asarray(batch_seqs[:, :max_len], jnp.float32)
    B, T, D = x.shape
    H = params["w_hh"].shape[0]
    K = params["w_tag"].shape[1]
    lengths = jnp.asarray(seqs_len, jnp.int32)

    h = jnp.zeros((B, H), jnp.float32)
    c = jnp.zeros((B, H), jnp.float32)
    outs = []
    for t in range(T):
        m = (t < lengths).astype(jnp.float32)[:, None]
        gates = x[:, t] @ params["w_ih"] + h @ params["w_hh"] + params["b"]
        i_g = jax.nn.sigmoid(gates[:, 0:H])
        f_g = jax.nn.sigmoid(gates[:, H:2 * H])
        g_g = jnp.tanh(gates[:, 2 * H:3 * H])
        o_g = jax.nn.sigmoid(gates[:, 3 * H:4 * H])
        c_new = f_g * c + i_g * g_g
        h_new = o_g * jnp.tanh(c_new)
        c = m * c_new + (1.0 - m) * c
        h = m * h_new + (1.0 - m) * h
        outs.append(m * h_new)
    out = jnp.stack(outs, axis=1)                               # (B, T, H)
    logits = out @ params["w_tag"] + params["b_tag"]            # (B, T, K)
    logits = logits.reshape(-1, K)
    return jax.nn.log_softmax(logits, axis=1)


# ----------------------------------------------------------------------------
# Deterministic parameter construction (PyTorch-style uniform(-1/sqrt(H), ..)).
# ----------------------------------------------------------------------------
def make_params(key, input_dim, hidden_dim, tagset_size):
    ks = jax.random.split(key, 6)
    s = 1.0 / np.sqrt(hidden_dim)
    w_ih = jax.random.uniform(ks[0], (input_dim, 4 * hidden_dim), jnp.float32, -s, s)
    w_hh = jax.random.uniform(ks[1], (hidden_dim, 4 * hidden_dim), jnp.float32, -s, s)
    b_ih = jax.random.uniform(ks[2], (4 * hidden_dim,), jnp.float32, -s, s)
    b_hh = jax.random.uniform(ks[3], (4 * hidden_dim,), jnp.float32, -s, s)
    w_tag = jax.random.uniform(ks[4], (hidden_dim, tagset_size), jnp.float32, -s, s)
    b_tag = jax.random.uniform(ks[5], (tagset_size,), jnp.float32, -s, s)
    return {
        "w_ih": w_ih,
        "w_hh": w_hh,
        "b": (b_ih + b_hh)[None, :],
        "w_tag": w_tag,
        "b_tag": b_tag[None, :],
    }
    # TODO(synk): embed_dim>0 / interm_dim>0 / bidirectional / multi-layer /
    # dropout variants not wired (module defaults used).


if __name__ == "__main__":
    key = jax.random.PRNGKey(0)
    k_x, k_p, k_x2 = jax.random.split(key, 3)

    # --- primary check: small shapes consistent with the module forward -----
    B, T, D, H, K = 2, 8, 16, 32, 5
    batch_seqs = jax.random.normal(k_x, (B, T, D), jnp.float32)
    seqs_len = np.array([8, 5], dtype=np.int64)          # pack semantics

    params = make_params(k_p, D, H, K)

    tag_scores, tag_prob = rnn_labeler_forward(batch_seqs, seqs_len, params,
                                               tagprob=True)
    tag_scores = jax.block_until_ready(tag_scores)
    tag_prob = jax.block_until_ready(tag_prob)

    ref_scores = np.asarray(ref_forward(batch_seqs, seqs_len, params))
    got_scores = np.asarray(tag_scores)
    assert got_scores.shape == (B * T, K)
    np.testing.assert_allclose(got_scores, ref_scores, rtol=1e-4, atol=1e-4)
    np.testing.assert_allclose(np.asarray(tag_prob), np.exp(ref_scores),
                               rtol=1e-4, atol=1e-4)

    # --- second check: exercises batch tiling (2 tiles), batch/time padding
    #     and multi-chunk streaming with the h/c scratch carry ---------------
    B2, T2 = 10, 20
    batch_seqs2 = jax.random.normal(k_x2, (B2, T2, D), jnp.float32)
    seqs_len2 = np.array([20, 18, 15, 12, 9, 7, 5, 3, 2, 1], dtype=np.int64)

    tag_scores2, _ = rnn_labeler_forward(batch_seqs2, seqs_len2, params,
                                         tagprob=False, time_chunk=8)
    tag_scores2 = jax.block_until_ready(tag_scores2)
    ref_scores2 = np.asarray(ref_forward(batch_seqs2, seqs_len2, params))
    got_scores2 = np.asarray(tag_scores2)
    assert got_scores2.shape == (B2 * T2, K)
    np.testing.assert_allclose(got_scores2, ref_scores2, rtol=1e-4, atol=1e-4)

    print("KERNEL_OK")
</pallas_src>

<mosaic_0001>
module attributes {stable_mosaic.version = 11 : i64} {
  func.func @_lstm_tag_kernel(%arg0: i32, %arg1: i32, %arg2: memref<2x1xi32, #tpu.memory_space<vmem>>, %arg3: memref<8x2x128xf32, #tpu.memory_space<vmem>>, %arg4: memref<32x128xf32, #tpu.memory_space<vmem>>, %arg5: memref<32x128xf32, #tpu.memory_space<vmem>>, %arg6: memref<1x128xf32, #tpu.memory_space<vmem>>, %arg7: memref<8x2x128xf32, #tpu.memory_space<vmem>>, %arg8: memref<2x32xf32, #tpu.memory_space<vmem>>, %arg9: memref<2x32xf32, #tpu.memory_space<vmem>>) attributes {dimension_semantics = [#tpu.dimension_semantics<parallel>, #tpu.dimension_semantics<arbitrary>], iteration_bounds = array<i64: 1, 1>, scalar_prefetch = 0 : i64, scratch_operands = 2 : i64, tpu.core_type = #tpu.core_type<tc>, window_params = [{transform_indices = @transform_0, window_bounds = array<i64: 2, 1>}, {transform_indices = @transform_1, window_bounds = array<i64: 8, 2, 128>}, {pipeline_mode = #tpu.pipeline_mode<synchronous>, transform_indices = @transform_2, window_bounds = array<i64: 32, 128>}, {pipeline_mode = #tpu.pipeline_mode<synchronous>, transform_indices = @transform_3, window_bounds = array<i64: 32, 128>}, {pipeline_mode = #tpu.pipeline_mode<synchronous>, transform_indices = @transform_4, window_bounds = array<i64: 1, 128>}, {transform_indices = @transform_5, window_bounds = array<i64: 8, 2, 128>}]} {
    %c0_i32 = arith.constant 0 : i32
    %0 = arith.cmpi eq, %arg1, %c0_i32 : i32
    %1 = arith.extui %0 : i1 to i32
    %c0_i32_0 = arith.constant 0 : i32
    %2 = arith.cmpi ne, %1, %c0_i32_0 : i32
    scf.if %2 {
      %cst_113 = arith.constant 0.000000e+00 : f32
      %446 = vector.broadcast %cst_113 : f32 to vector<2x32xf32>
      %c0_114 = arith.constant 0 : index
      %c0_115 = arith.constant 0 : index
      %447 = vector.load %arg8[%c0_114, %c0_115] : memref<2x32xf32, #tpu.memory_space<vmem>>, vector<2x32xf32>
      tpu.vector_store %arg8[%c0_114, %c0_115], %446 {strides = array<i32>} : memref<2x32xf32, #tpu.memory_space<vmem>>, vector<2x32xf32>,
      %cst_116 = arith.constant 0.000000e+00 : f32
      %448 = vector.broadcast %cst_116 : f32 to vector<2x32xf32>
      %c0_117 = arith.constant 0 : index
      %c0_118 = arith.constant 0 : index
      %449 = vector.load %arg9[%c0_117, %c0_118] : memref<2x32xf32, #tpu.memory_space<vmem>>, vector<2x32xf32>
      tpu.vector_store %arg9[%c0_117, %c0_118], %448 {strides = array<i32>} : memref<2x32xf32, #tpu.memory_space<vmem>>, vector<2x32xf32>,
    } else {
    }
    %c0 = arith.constant 0 : index
    %c0_1 = arith.constant 0 : index
    %3 = vector.load %arg4[%c0, %c0_1] : memref<32x128xf32, #tpu.memory_space<vmem>>, vector<32x128xf32>
    %c0_2 = arith.constant 0 : index
    %c0_3 = arith.constant 0 : index
    %4 = vector.load %arg5[%c0_2, %c0_3] : memref<32x128xf32, #tpu.memory_space<vmem>>, vector<32x128xf32>
    %c0_4 = arith.constant 0 : index
    %c0_5 = arith.constant 0 : index
    %5 = vector.load %arg6[%c0_4, %c0_5] : memref<1x128xf32, #tpu.memory_space<vmem>>, vector<1x128xf32>
    %c0_6 = arith.constant 0 : index
    %c0_7 = arith.constant 0 : index
    %6 = vector.load %arg2[%c0_6, %c0_7] : memref<2x1xi32, #tpu.memory_space<vmem>>, vector<2x1xi32>
    %7 = vector.shape_cast %6 : vector<2x1xi32> to vector<2x1xi32>
    %8 = vector.broadcast %7 : vector<2x1xi32> to vector<2x32xi32>
    %c8_i32 = arith.constant 8 : i32
    %9 = arith.muli %arg1, %c8_i32 : i32
    %c0_8 = arith.constant 0 : index
    %c0_9 = arith.constant 0 : index
    %10 = vector.load %arg8[%c0_8, %c0_9] : memref<2x32xf32, #tpu.memory_space<vmem>>, vector<2x32xf32>
    %c0_10 = arith.constant 0 : index
    %c0_11 = arith.constant 0 : index
    %11 = vector.load %arg9[%c0_10, %c0_11] : memref<2x32xf32, #tpu.memory_space<vmem>>, vector<2x32xf32>
    %c0_i32_12 = arith.constant 0 : i32
    %12 = arith.index_cast %c0_i32_12 : i32 to index
    %c0_13 = arith.constant 0 : index
    %c0_14 = arith.constant 0 : index
    %13 = vector.load %arg3[%12, %c0_13, %c0_14] : memref<8x2x128xf32, #tpu.memory_space<vmem>>, vector<1x2x128xf32>
    %14 = vector.shape_cast %13 : vector<1x2x128xf32> to vector<2x128xf32>
    %cst = arith.constant dense<0.000000e+00> : vector<2x128xf32>
    %15 = tpu.matmul %10, %3, %cst {dimension_numbers = #tpu.dot_dimension_numbers<[1], [0], [0], [1], [0, 0, 1, 1], [], []>} : vector<2x32xf32>, vector<32x128xf32>, vector<2x128xf32> -> vector<2x128xf32>
    %16 = arith.addf %14, %15 : vector<2x128xf32>
    %17 = vector.extract_strided_slice %16 {offsets = [0, 0], sizes = [2, 32], strides = [1, 1]} : vector<2x128xf32> to vector<2x32xf32>
    %18 = arith.negf %17 : vector<2x32xf32>
    %19 = math.exp %18 : vector<2x32xf32>
    %cst_15 = arith.constant 1.000000e+00 : f32
    %20 = vector.broadcast %cst_15 : f32 to vector<2x32xf32>
    %21 = arith.addf %20, %19 : vector<2x32xf32>
    %22 = arith.divf %20, %21 : vector<2x32xf32>
    %23 = vector.extract_strided_slice %16 {offsets = [0, 32], sizes = [2, 32], strides = [1, 1]} : vector<2x128xf32> to vector<2x32xf32>
    %24 = arith.negf %23 : vector<2x32xf32>
    %25 = math.exp %24 : vector<2x32xf32>
    %cst_16 = arith.constant 1.000000e+00 : f32
    %26 = vector.broadcast %cst_16 : f32 to vector<2x32xf32>
    %27 = arith.addf %26, %25 : vector<2x32xf32>
    %28 = arith.divf %26, %27 : vector<2x32xf32>
    %29 = vector.extract_strided_slice %16 {offsets = [0, 64], sizes = [2, 32], strides = [1, 1]} : vector<2x128xf32> to vector<2x32xf32>
    %30 = math.tanh %29 : vector<2x32xf32>
    %31 = vector.extract_strided_slice %16 {offsets = [0, 96], sizes = [2, 32], strides = [1, 1]} : vector<2x128xf32> to vector<2x32xf32>
    %32 = arith.negf %31 : vector<2x32xf32>
    %33 = math.exp %32 : vector<2x32xf32>
    %cst_17 = arith.constant 1.000000e+00 : f32
    %34 = vector.broadcast %cst_17 : f32 to vector<2x32xf32>
    %35 = arith.addf %34, %33 : vector<2x32xf32>
    %36 = arith.divf %34, %35 : vector<2x32xf32>
    %37 = arith.mulf %28, %11 : vector<2x32xf32>
    %38 = arith.mulf %22, %30 : vector<2x32xf32>
    %39 = arith.addf %37, %38 : vector<2x32xf32>
    %40 = math.tanh %39 : vector<2x32xf32>
    %41 = arith.mulf %36, %40 : vector<2x32xf32>
    %42 = arith.addi %9, %c0_i32_12 : i32
    %43 = vector.broadcast %42 : i32 to vector<2x32xi32>
    %44 = arith.cmpi slt, %43, %8 : vector<2x32xi32>
    %cst_18 = arith.constant 0.000000e+00 : f32
    %45 = vector.broadcast %cst_18 : f32 to vector<2x32xf32>
    %46 = arith.select %44, %41, %45 : vector<2x32xi1>, vector<2x32xf32>
    %cst_19 = arith.constant dense<0.000000e+00> : vector<2x128xf32>
    %47 = tpu.matmul %46, %4, %cst_19 {dimension_numbers = #tpu.dot_dimension_numbers<[1], [0], [0], [1], [0, 0, 1, 1], [], []>} : vector<2x32xf32>, vector<32x128xf32>, vector<2x128xf32> -> vector<2x128xf32>
    %48 = vector.broadcast %5 : vector<1x128xf32> to vector<2x128xf32>
    %49 = arith.addf %47, %48 : vector<2x128xf32>
    %cst_20 = arith.constant dense<0xFF800000> : vector<2xf32>
    %50 = vector.multi_reduction <maximumf>, %49, %cst_20 [1] : vector<2x128xf32> to vector<2xf32>
    %51 = vector.shape_cast %50 : vector<2xf32> to vector<2x1xf32>
    %52 = vector.broadcast %51 : vector<2x1xf32> to vector<2x128xf32>
    %53 = arith.subf %49, %52 : vector<2x128xf32>
    %54 = math.exp %53 : vector<2x128xf32>
    %cst_21 = arith.constant dense<0.000000e+00> : vector<2xf32>
    %55 = vector.multi_reduction <add>, %54, %cst_21 [1] : vector<2x128xf32> to vector<2xf32>
    %56 = vector.shape_cast %55 : vector<2xf32> to vector<2x1xf32>
    %57 = math.log %56 : vector<2x1xf32>
    %58 = vector.broadcast %57 : vector<2x1xf32> to vector<2x128xf32>
    %59 = arith.subf %53, %58 : vector<2x128xf32>
    %60 = arith.index_cast %c0_i32_12 : i32 to index
    %c0_22 = arith.constant 0 : index
    %c0_23 = arith.constant 0 : index
    %61 = vector.load %arg7[%60, %c0_22, %c0_23] : memref<8x2x128xf32, #tpu.memory_space<vmem>>, vector<1x2x128xf32>
    %62 = vector.shape_cast %61 : vector<1x2x128xf32> to vector<2x128xf32>
    %63 = vector.shape_cast %59 : vector<2x128xf32> to vector<1x2x128xf32>
    tpu.vector_store %arg7[%60, %c0_22, %c0_23], %63 {strides = array<i32>} : memref<8x2x128xf32, #tpu.memory_space<vmem>>, vector<1x2x128xf32>,
    %64 = arith.select %44, %41, %10 : vector<2x32xi1>, vector<2x32xf32>
    %65 = arith.select %44, %39, %11 : vector<2x32xi1>, vector<2x32xf32>
    %c1_i32 = arith.constant 1 : i32
    %66 = arith.index_cast %c1_i32 : i32 to index
    %c0_24 = arith.constant 0 : index
    %c0_25 = arith.constant 0 : index
    %67 = vector.load %arg3[%66, %c0_24, %c0_25] : memref<8x2x128xf32, #tpu.memory_space<vmem>>, vector<1x2x128xf32>
    %68 = vector.shape_cast %67 : vector<1x2x128xf32> to vector<2x128xf32>
    %cst_26 = arith.constant dense<0.000000e+00> : vector<2x128xf32>
    %69 = tpu.matmul %64, %3, %cst_26 {dimension_numbers = #tpu.dot_dimension_numbers<[1], [0], [0], [1], [0, 0, 1, 1], [], []>} : vector<2x32xf32>, vector<32x128xf32>, vector<2x128xf32> -> vector<2x128xf32>
    %70 = arith.addf %68, %69 : vector<2x128xf32>
    %71 = vector.extract_strided_slice %70 {offsets = [0, 0], sizes = [2, 32], strides = [1, 1]} : vector<2x128xf32> to vector<2x32xf32>
    %72 = arith.negf %71 : vector<2x32xf32>
    %73 = math.exp %72 : vector<2x32xf32>
    %cst_27 = arith.constant 1.000000e+00 : f32
    %74 = vector.broadcast %cst_27 : f32 to vector<2x32xf32>
    %75 = arith.addf %74, %73 : vector<2x32xf32>
    %76 = arith.divf %74, %75 : vector<2x32xf32>
    %77 = vector.extract_strided_slice %70 {offsets = [0, 32], sizes = [2, 32], strides = [1, 1]} : vector<2x128xf32> to vector<2x32xf32>
    %78 = arith.negf %77 : vector<2x32xf32>
    %79 = math.exp %78 : vector<2x32xf32>
    %cst_28 = arith.constant 1.000000e+00 : f32
    %80 = vector.broadcast %cst_28 : f32 to vector<2x32xf32>
    %81 = arith.addf %80, %79 : vector<2x32xf32>
    %82 = arith.divf %80, %81 : vector<2x32xf32>
    %83 = vector.extract_strided_slice %70 {offsets = [0, 64], sizes = [2, 32], strides = [1, 1]} : vector<2x128xf32> to vector<2x32xf32>
    %84 = math.tanh %83 : vector<2x32xf32>
    %85 = vector.extract_strided_slice %70 {offsets = [0, 96], sizes = [2, 32], strides = [1, 1]} : vector<2x128xf32> to vector<2x32xf32>
    %86 = arith.negf %85 : vector<2x32xf32>
    %87 = math.exp %86 : vector<2x32xf32>
    %cst_29 = arith.constant 1.000000e+00 : f32
    %88 = vector.broadcast %cst_29 : f32 to vector<2x32xf32>
    %89 = arith.addf %88, %87 : vector<2x32xf32>
    %90 = arith.divf %88, %89 : vector<2x32xf32>
    %91 = arith.mulf %82, %65 : vector<2x32xf32>
    %92 = arith.mulf %76, %84 : vector<2x32xf32>
    %93 = arith.addf %91, %92 : vector<2x32xf32>
    %94 = math.tanh %93 : vector<2x32xf32>
    %95 = arith.mulf %90, %94 : vector<2x32xf32>
    %96 = arith.addi %9, %c1_i32 : i32
    %97 = vector.broadcast %96 : i32 to vector<2x32xi32>
    %98 = arith.cmpi slt, %97, %8 : vector<2x32xi32>
    %cst_30 = arith.constant 0.000000e+00 : f32
    %99 = vector.broadcast %cst_30 : f32 to vector<2x32xf32>
    %100 = arith.select %98, %95, %99 : vector<2x32xi1>, vector<2x32xf32>
    %cst_31 = arith.constant dense<0.000000e+00> : vector<2x128xf32>
    %101 = tpu.matmul %100, %4, %cst_31 {dimension_numbers = #tpu.dot_dimension_numbers<[1], [0], [0], [1], [0, 0, 1, 1], [], []>} : vector<2x32xf32>, vector<32x128xf32>, vector<2x128xf32> -> vector<2x128xf32>
    %102 = vector.broadcast %5 : vector<1x128xf32> to vector<2x128xf32>
    %103 = arith.addf %101, %102 : vector<2x128xf32>
    %cst_32 = arith.constant dense<0xFF800000> : vector<2xf32>
    %104 = vector.multi_reduction <maximumf>, %103, %cst_32 [1] : vector<2x128xf32> to vector<2xf32>
    %105 = vector.shape_cast %104 : vector<2xf32> to vector<2x1xf32>
    %106 = vector.broadcast %105 : vector<2x1xf32> to vector<2x128xf32>
    %107 = arith.subf %103, %106 : vector<2x128xf32>
    %108 = math.exp %107 : vector<2x128xf32>
    %cst_33 = arith.constant dense<0.000000e+00> : vector<2xf32>
    %109 = vector.multi_reduction <add>, %108, %cst_33 [1] : vector<2x128xf32> to vector<2xf32>
    %110 = vector.shape_cast %109 : vector<2xf32> to vector<2x1xf32>
    %111 = math.log %110 : vector<2x1xf32>
    %112 = vector.broadcast %111 : vector<2x1xf32> to vector<2x128xf32>
    %113 = arith.subf %107, %112 : vector<2x128xf32>
    %114 = arith.index_cast %c1_i32 : i32 to index
    %c0_34 = arith.constant 0 : index
    %c0_35 = arith.constant 0 : index
    %115 = vector.load %arg7[%114, %c0_34, %c0_35] : memref<8x2x128xf32, #tpu.memory_space<vmem>>, vector<1x2x128xf32>
    %116 = vector.shape_cast %115 : vector<1x2x128xf32> to vector<2x128xf32>
    %117 = vector.shape_cast %113 : vector<2x128xf32> to vector<1x2x128xf32>
    tpu.vector_store %arg7[%114, %c0_34, %c0_35], %117 {strides = array<i32>} : memref<8x2x128xf32, #tpu.memory_space<vmem>>, vector<1x2x128xf32>,
    %118 = arith.select %98, %95, %64 : vector<2x32xi1>, vector<2x32xf32>
    %119 = arith.select %98, %93, %65 : vector<2x32xi1>, vector<2x32xf32>
    %c2_i32 = arith.constant 2 : i32
    %120 = arith.index_cast %c2_i32 : i32 to index
    %c0_36 = arith.constant 0 : index
    %c0_37 = arith.constant 0 : index
    %121 = vector.load %arg3[%120, %c0_36, %c0_37] : memref<8x2x128xf32, #tpu.memory_space<vmem>>, vector<1x2x128xf32>
    %122 = vector.shape_cast %121 : vector<1x2x128xf32> to vector<2x128xf32>
    %cst_38 = arith.constant dense<0.000000e+00> : vector<2x128xf32>
    %123 = tpu.matmul %118, %3, %cst_38 {dimension_numbers = #tpu.dot_dimension_numbers<[1], [0], [0], [1], [0, 0, 1, 1], [], []>} : vector<2x32xf32>, vector<32x128xf32>, vector<2x128xf32> -> vector<2x128xf32>
    %124 = arith.addf %122, %123 : vector<2x128xf32>
    %125 = vector.extract_strided_slice %124 {offsets = [0, 0], sizes = [2, 32], strides = [1, 1]} : vector<2x128xf32> to vector<2x32xf32>
    %126 = arith.negf %125 : vector<2x32xf32>
    %127 = math.exp %126 : vector<2x32xf32>
    %cst_39 = arith.constant 1.000000e+00 : f32
    %128 = vector.broadcast %cst_39 : f32 to vector<2x32xf32>
    %129 = arith.addf %128, %127 : vector<2x32xf32>
    %130 = arith.divf %128, %129 : vector<2x32xf32>
    %131 = vector.extract_strided_slice %124 {offsets = [0, 32], sizes = [2, 32], strides = [1, 1]} : vector<2x128xf32> to vector<2x32xf32>
    %132 = arith.negf %131 : vector<2x32xf32>
    %133 = math.exp %132 : vector<2x32xf32>
    %cst_40 = arith.constant 1.000000e+00 : f32
    %134 = vector.broadcast %cst_40 : f32 to vector<2x32xf32>
    %135 = arith.addf %134, %133 : vector<2x32xf32>
    %136 = arith.divf %134, %135 : vector<2x32xf32>
    %137 = vector.extract_strided_slice %124 {offsets = [0, 64], sizes = [2, 32], strides = [1, 1]} : vector<2x128xf32> to vector<2x32xf32>
    %138 = math.tanh %137 : vector<2x32xf32>
    %139 = vector.extract_strided_slice %124 {offsets = [0, 96], sizes = [2, 32], strides = [1, 1]} : vector<2x128xf32> to vector<2x32xf32>
    %140 = arith.negf %139 : vector<2x32xf32>
    %141 = math.exp %140 : vector<2x32xf32>
    %cst_41 = arith.constant 1.000000e+00 : f32
    %142 = vector.broadcast %cst_41 : f32 to vector<2x32xf32>
    %143 = arith.addf %142, %141 : vector<2x32xf32>
    %144 = arith.divf %142, %143 : vector<2x32xf32>
    %145 = arith.mulf %136, %119 : vector<2x32xf32>
    %146 = arith.mulf %130, %138 : vector<2x32xf32>
    %147 = arith.addf %145, %146 : vector<2x32xf32>
    %148 = math.tanh %147 : vector<2x32xf32>
    %149 = arith.mulf %144, %148 : vector<2x32xf32>
    %150 = arith.addi %9, %c2_i32 : i32
    %151 = vector.broadcast %150 : i32 to vector<2x32xi32>
    %152 = arith.cmpi slt, %151, %8 : vector<2x32xi32>
    %cst_42 = arith.constant 0.000000e+00 : f32
    %153 = vector.broadcast %cst_42 : f32 to vector<2x32xf32>
    %154 = arith.select %152, %149, %153 : vector<2x32xi1>, vector<2x32xf32>
    %cst_43 = arith.constant dense<0.000000e+00> : vector<2x128xf32>
    %155 = tpu.matmul %154, %4, %cst_43 {dimension_numbers = #tpu.dot_dimension_numbers<[1], [0], [0], [1], [0, 0, 1, 1], [], []>} : vector<2x32xf32>, vector<32x128xf32>, vector<2x128xf32> -> vector<2x128xf32>
    %156 = vector.broadcast %5 : vector<1x128xf32> to vector<2x128xf32>
    %157 = arith.addf %155, %156 : vector<2x128xf32>
    %cst_44 = arith.constant dense<0xFF800000> : vector<2xf32>
    %158 = vector.multi_reduction <maximumf>, %157, %cst_44 [1] : vector<2x128xf32> to vector<2xf32>
    %159 = vector.shape_cast %158 : vector<2xf32> to vector<2x1xf32>
    %160 = vector.broadcast %159 : vector<2x1xf32> to vector<2x128xf32>
    %161 = arith.subf %157, %160 : vector<2x128xf32>
    %162 = math.exp %161 : vector<2x128xf32>
    %cst_45 = arith.constant dense<0.000000e+00> : vector<2xf32>
    %163 = vector.multi_reduction <add>, %162, %cst_45 [1] : vector<2x128xf32> to vector<2xf32>
    %164 = vector.shape_cast %163 : vector<2xf32> to vector<2x1xf32>
    %165 = math.log %164 : vector<2x1xf32>
    %166 = vector.broadcast %165 : vector<2x1xf32> to vector<2x128xf32>
    %167 = arith.subf %161, %166 : vector<2x128xf32>
    %168 = arith.index_cast %c2_i32 : i32 to index
    %c0_46 = arith.constant 0 : index
    %c0_47 = arith.constant 0 : index
    %169 = vector.load %arg7[%168, %c0_46, %c0_47] : memref<8x2x128xf32, #tpu.memory_space<vmem>>, vector<1x2x128xf32>
    %170 = vector.shape_cast %169 : vector<1x2x128xf32> to vector<2x128xf32>
    %171 = vector.shape_cast %167 : vector<2x128xf32> to vector<1x2x128xf32>
    tpu.vector_store %arg7[%168, %c0_46, %c0_47], %171 {strides = array<i32>} : memref<8x2x128xf32, #tpu.memory_space<vmem>>, vector<1x2x128xf32>,
    %172 = arith.select %152, %149, %118 : vector<2x32xi1>, vector<2x32xf32>
    %173 = arith.select %152, %147, %119 : vector<2x32xi1>, vector<2x32xf32>
    %c3_i32 = arith.constant 3 : i32
    %174 = arith.index_cast %c3_i32 : i32 to index
    %c0_48 = arith.constant 0 : index
    %c0_49 = arith.constant 0 : index
    %175 = vector.load %arg3[%174, %c0_48, %c0_49] : memref<8x2x128xf32, #tpu.memory_space<vmem>>, vector<1x2x128xf32>
    %176 = vector.shape_cast %175 : vector<1x2x128xf32> to vector<2x128xf32>
    %cst_50 = arith.constant dense<0.000000e+00> : vector<2x128xf32>
    %177 = tpu.matmul %172, %3, %cst_50 {dimension_numbers = #tpu.dot_dimension_numbers<[1], [0], [0], [1], [0, 0, 1, 1], [], []>} : vector<2x32xf32>, vector<32x128xf32>, vector<2x128xf32> -> vector<2x128xf32>
    %178 = arith.addf %176, %177 : vector<2x128xf32>
    %179 = vector.extract_strided_slice %178 {offsets = [0, 0], sizes = [2, 32], strides = [1, 1]} : vector<2x128xf32> to vector<2x32xf32>
    %180 = arith.negf %179 : vector<2x32xf32>
    %181 = math.exp %180 : vector<2x32xf32>
    %cst_51 = arith.constant 1.000000e+00 : f32
    %182 = vector.broadcast %cst_51 : f32 to vector<2x32xf32>
    %183 = arith.addf %182, %181 : vector<2x32xf32>
    %184 = arith.divf %182, %183 : vector<2x32xf32>
    %185 = vector.extract_strided_slice %178 {offsets = [0, 32], sizes = [2, 32], strides = [1, 1]} : vector<2x128xf32> to vector<2x32xf32>
    %186 = arith.negf %185 : vector<2x32xf32>
    %187 = math.exp %186 : vector<2x32xf32>
    %cst_52 = arith.constant 1.000000e+00 : f32
    %188 = vector.broadcast %cst_52 : f32 to vector<2x32xf32>
    %189 = arith.addf %188, %187 : vector<2x32xf32>
    %190 = arith.divf %188, %189 : vector<2x32xf32>
    %191 = vector.extract_strided_slice %178 {offsets = [0, 64], sizes = [2, 32], strides = [1, 1]} : vector<2x128xf32> to vector<2x32xf32>
    %192 = math.tanh %191 : vector<2x32xf32>
    %193 = vector.extract_strided_slice %178 {offsets = [0, 96], sizes = [2, 32], strides = [1, 1]} : vector<2x128xf32> to vector<2x32xf32>
    %194 = arith.negf %193 : vector<2x32xf32>
    %195 = math.exp %194 : vector<2x32xf32>
    %cst_53 = arith.constant 1.000000e+00 : f32
    %196 = vector.broadcast %cst_53 : f32 to vector<2x32xf32>
    %197 = arith.addf %196, %195 : vector<2x32xf32>
    %198 = arith.divf %196, %197 : vector<2x32xf32>
    %199 = arith.mulf %190, %173 : vector<2x32xf32>
    %200 = arith.mulf %184, %192 : vector<2x32xf32>
    %201 = arith.addf %199, %200 : vector<2x32xf32>
    %202 = math.tanh %201 : vector<2x32xf32>
    %203 = arith.mulf %198, %202 : vector<2x32xf32>
    %204 = arith.addi %9, %c3_i32 : i32
    %205 = vector.broadcast %204 : i32 to vector<2x32xi32>
    %206 = arith.cmpi slt, %205, %8 : vector<2x32xi32>
    %cst_54 = arith.constant 0.000000e+00 : f32
    %207 = vector.broadcast %cst_54 : f32 to vector<2x32xf32>
    %208 = arith.select %206, %203, %207 : vector<2x32xi1>, vector<2x32xf32>
    %cst_55 = arith.constant dense<0.000000e+00> : vector<2x128xf32>
    %209 = tpu.matmul %208, %4, %cst_55 {dimension_numbers = #tpu.dot_dimension_numbers<[1], [0], [0], [1], [0, 0, 1, 1], [], []>} : vector<2x32xf32>, vector<32x128xf32>, vector<2x128xf32> -> vector<2x128xf32>
    %210 = vector.broadcast %5 : vector<1x128xf32> to vector<2x128xf32>
    %211 = arith.addf %209, %210 : vector<2x128xf32>
    %cst_56 = arith.constant dense<0xFF800000> : vector<2xf32>
    %212 = vector.multi_reduction <maximumf>, %211, %cst_56 [1] : vector<2x128xf32> to vector<2xf32>
    %213 = vector.shape_cast %212 : vector<2xf32> to vector<2x1xf32>
    %214 = vector.broadcast %213 : vector<2x1xf32> to vector<2x128xf32>
    %215 = arith.subf %211, %214 : vector<2x128xf32>
    %216 = math.exp %215 : vector<2x128xf32>
    %cst_57 = arith.constant dense<0.000000e+00> : vector<2xf32>
    %217 = vector.multi_reduction <add>, %216, %cst_57 [1] : vector<2x128xf32> to vector<2xf32>
    %218 = vector.shape_cast %217 : vector<2xf32> to vector<2x1xf32>
    %219 = math.log %218 : vector<2x1xf32>
    %220 = vector.broadcast %219 : vector<2x1xf32> to vector<2x128xf32>
    %221 = arith.subf %215, %220 : vector<2x128xf32>
    %222 = arith.index_cast %c3_i32 : i32 to index
    %c0_58 = arith.constant 0 : index
    %c0_59 = arith.constant 0 : index
    %223 = vector.load %arg7[%222, %c0_58, %c0_59] : memref<8x2x128xf32, #tpu.memory_space<vmem>>, vector<1x2x128xf32>
    %224 = vector.shape_cast %223 : vector<1x2x128xf32> to vector<2x128xf32>
    %225 = vector.shape_cast %221 : vector<2x128xf32> to vector<1x2x128xf32>
    tpu.vector_store %arg7[%222, %c0_58, %c0_59], %225 {strides = array<i32>} : memref<8x2x128xf32, #tpu.memory_space<vmem>>, vector<1x2x128xf32>,
    %226 = arith.select %206, %203, %172 : vector<2x32xi1>, vector<2x32xf32>
    %227 = arith.select %206, %201, %173 : vector<2x32xi1>, vector<2x32xf32>
    %c4_i32 = arith.constant 4 : i32
    %228 = arith.index_cast %c4_i32 : i32 to index
    %c0_60 = arith.constant 0 : index
    %c0_61 = arith.constant 0 : index
    %229 = vector.load %arg3[%228, %c0_60, %c0_61] : memref<8x2x128xf32, #tpu.memory_space<vmem>>, vector<1x2x128xf32>
    %230 = vector.shape_cast %229 : vector<1x2x128xf32> to vector<2x128xf32>
    %cst_62 = arith.constant dense<0.000000e+00> : vector<2x128xf32>
    %231 = tpu.matmul %226, %3, %cst_62 {dimension_numbers = #tpu.dot_dimension_numbers<[1], [0], [0], [1], [0, 0, 1, 1], [], []>} : vector<2x32xf32>, vector<32x128xf32>, vector<2x128xf32> -> vector<2x128xf32>
    %232 = arith.addf %230, %231 : vector<2x128xf32>
    %233 = vector.extract_strided_slice %232 {offsets = [0, 0], sizes = [2, 32], strides = [1, 1]} : vector<2x128xf32> to vector<2x32xf32>
    %234 = arith.negf %233 : vector<2x32xf32>
    %235 = math.exp %234 : vector<2x32xf32>
    %cst_63 = arith.constant 1.000000e+00 : f32
    %236 = vector.broadcast %cst_63 : f32 to vector<2x32xf32>
    %237 = arith.addf %236, %235 : vector<2x32xf32>
    %238 = arith.divf %236, %237 : vector<2x32xf32>
    %239 = vector.extract_strided_slice %232 {offsets = [0, 32], sizes = [2, 32], strides = [1, 1]} : vector<2x128xf32> to vector<2x32xf32>
    %240 = arith.negf %239 : vector<2x32xf32>
    %241 = math.exp %240 : vector<2x32xf32>
    %cst_64 = arith.constant 1.000000e+00 : f32
    %242 = vector.broadcast %cst_64 : f32 to vector<2x32xf32>
    %243 = arith.addf %242, %241 : vector<2x32xf32>
    %244 = arith.divf %242, %243 : vector<2x32xf32>
    %245 = vector.extract_strided_slice %232 {offsets = [0, 64], sizes = [2, 32], strides = [1, 1]} : vector<2x128xf32> to vector<2x32xf32>
    %246 = math.tanh %245 : vector<2x32xf32>
    %247 = vector.extract_strided_slice %232 {offsets = [0, 96], sizes = [2, 32], strides = [1, 1]} : vector<2x128xf32> to vector<2x32xf32>
    %248 = arith.negf %247 : vector<2x32xf32>
    %249 = math.exp %248 : vector<2x32xf32>
    %cst_65 = arith.constant 1.000000e+00 : f32
    %250 = vector.broadcast %cst_65 : f32 to vector<2x32xf32>
    %251 = arith.addf %250, %249 : vector<2x32xf32>
    %252 = arith.divf %250, %251 : vector<2x32xf32>
    %253 = arith.mulf %244, %227 : vector<2x32xf32>
    %254 = arith.mulf %238, %246 : vector<2x32xf32>
    %255 = arith.addf %253, %254 : vector<2x32xf32>
    %256 = math.tanh %255 : vector<2x32xf32>
    %257 = arith.mulf %252, %256 : vector<2x32xf32>
    %258 = arith.addi %9, %c4_i32 : i32
    %259 = vector.broadcast %258 : i32 to vector<2x32xi32>
    %260 = arith.cmpi slt, %259, %8 : vector<2x32xi32>
    %cst_66 = arith.constant 0.000000e+00 : f32
    %261 = vector.broadcast %cst_66 : f32 to vector<2x32xf32>
    %262 = arith.select %260, %257, %261 : vector<2x32xi1>, vector<2x32xf32>
    %cst_67 = arith.constant dense<0.000000e+00> : vector<2x128xf32>
    %263 = tpu.matmul %262, %4, %cst_67 {dimension_numbers = #tpu.dot_dimension_numbers<[1], [0], [0], [1], [0, 0, 1, 1], [], []>} : vector<2x32xf32>, vector<32x128xf32>, vector<2x128xf32> -> vector<2x128xf32>
    %264 = vector.broadcast %5 : vector<1x128xf32> to vector<2x128xf32>
    %265 = arith.addf %263, %264 : vector<2x128xf32>
    %cst_68 = arith.constant dense<0xFF800000> : vector<2xf32>
    %266 = vector.multi_reduction <maximumf>, %265, %cst_68 [1] : vector<2x128xf32> to vector<2xf32>
    %267 = vector.shape_cast %266 : vector<2xf32> to vector<2x1xf32>
    %268 = vector.broadcast %267 : vector<2x1xf32> to vector<2x128xf32>
    %269 = arith.subf %265, %268 : vector<2x128xf32>
    %270 = math.exp %269 : vector<2x128xf32>
    %cst_69 = arith.constant dense<0.000000e+00> : vector<2xf32>
    %271 = vector.multi_reduction <add>, %270, %cst_69 [1] : vector<2x128xf32> to vector<2xf32>
    %272 = vector.shape_cast %271 : vector<2xf32> to vector<2x1xf32>
    %273 = math.log %272 : vector<2x1xf32>
    %274 = vector.broadcast %273 : vector<2x1xf32> to vector<2x128xf32>
    %275 = arith.subf %269, %274 : vector<2x128xf32>
    %276 = arith.index_cast %c4_i32 : i32 to index
    %c0_70 = arith.constant 0 : index
    %c0_71 = arith.constant 0 : index
    %277 = vector.load %arg7[%276, %c0_70, %c0_71] : memref<8x2x128xf32, #tpu.memory_space<vmem>>, vector<1x2x128xf32>
    %278 = vector.shape_cast %277 : vector<1x2x128xf32> to vector<2x128xf32>
    %279 = vector.shape_cast %275 : vector<2x128xf32> to vector<1x2x128xf32>
    tpu.vector_store %arg7[%276, %c0_70, %c0_71], %279 {strides = array<i32>} : memref<8x2x128xf32, #tpu.memory_space<vmem>>, vector<1x2x128xf32>,
    %280 = arith.select %260, %257, %226 : vector<2x32xi1>, vector<2x32xf32>
    %281 = arith.select %260, %255, %227 : vector<2x32xi1>, vector<2x32xf32>
    %c5_i32 = arith.constant 5 : i32
    %282 = arith.index_cast %c5_i32 : i32 to index
    %c0_72 = arith.constant 0 : index
    %c0_73 = arith.constant 0 : index
    %283 = vector.load %arg3[%282, %c0_72, %c0_73] : memref<8x2x128xf32, #tpu.memory_space<vmem>>, vector<1x2x128xf32>
    %284 = vector.shape_cast %283 : vector<1x2x128xf32> to vector<2x128xf32>
    %cst_74 = arith.constant dense<0.000000e+00> : vector<2x128xf32>
    %285 = tpu.matmul %280, %3, %cst_74 {dimension_numbers = #tpu.dot_dimension_numbers<[1], [0], [0], [1], [0, 0, 1, 1], [], []>} : vector<2x32xf32>, vector<32x128xf32>, vector<2x128xf32> -> vector<2x128xf32>
    %286 = arith.addf %284, %285 : vector<2x128xf32>
    %287 = vector.extract_strided_slice %286 {offsets = [0, 0], sizes = [2, 32], strides = [1, 1]} : vector<2x128xf32> to vector<2x32xf32>
    %288 = arith.negf %287 : vector<2x32xf32>
    %289 = math.exp %288 : vector<2x32xf32>
    %cst_75 = arith.constant 1.000000e+00 : f32
    %290 = vector.broadcast %cst_75 : f32 to vector<2x32xf32>
    %291 = arith.addf %290, %289 : vector<2x32xf32>
    %292 = arith.divf %290, %291 : vector<2x32xf32>
    %293 = vector.extract_strided_slice %286 {offsets = [0, 32], sizes = [2, 32], strides = [1, 1]} : vector<2x128xf32> to vector<2x32xf32>
    %294 = arith.negf %293 : vector<2x32xf32>
    %295 = math.exp %294 : vector<2x32xf32>
    %cst_76 = arith.constant 1.000000e+00 : f32
    %296 = vector.broadcast %cst_76 : f32 to vector<2x32xf32>
    %297 = arith.addf %296, %295 : vector<2x32xf32>
    %298 = arith.divf %296, %297 : vector<2x32xf32>
    %299 = vector.extract_strided_slice %286 {offsets = [0, 64], sizes = [2, 32], strides = [1, 1]} : vector<2x128xf32> to vector<2x32xf32>
    %300 = math.tanh %299 : vector<2x32xf32>
    %301 = vector.extract_strided_slice %286 {offsets = [0, 96], sizes = [2, 32], strides = [1, 1]} : vector<2x128xf32> to vector<2x32xf32>
    %302 = arith.negf %301 : vector<2x32xf32>
    %303 = math.exp %302 : vector<2x32xf32>
    %cst_77 = arith.constant 1.000000e+00 : f32
    %304 = vector.broadcast %cst_77 : f32 to vector<2x32xf32>
    %305 = arith.addf %304, %303 : vector<2x32xf32>
    %306 = arith.divf %304, %305 : vector<2x32xf32>
    %307 = arith.mulf %298, %281 : vector<2x32xf32>
    %308 = arith.mulf %292, %300 : vector<2x32xf32>
    %309 = arith.addf %307, %308 : vector<2x32xf32>
    %310 = math.tanh %309 : vector<2x32xf32>
    %311 = arith.mulf %306, %310 : vector<2x32xf32>
    %312 = arith.addi %9, %c5_i32 : i32
    %313 = vector.broadcast %312 : i32 to vector<2x32xi32>
    %314 = arith.cmpi slt, %313, %8 : vector<2x32xi32>
    %cst_78 = arith.constant 0.000000e+00 : f32
    %315 = vector.broadcast %cst_78 : f32 to vector<2x32xf32>
    %316 = arith.select %314, %311, %315 : vector<2x32xi1>, vector<2x32xf32>
    %cst_79 = arith.constant dense<0.000000e+00> : vector<2x128xf32>
    %317 = tpu.matmul %316, %4, %cst_79 {dimension_numbers = #tpu.dot_dimension_numbers<[1], [0], [0], [1], [0, 0, 1, 1], [], []>} : vector<2x32xf32>, vector<32x128xf32>, vector<2x128xf32> -> vector<2x128xf32>
    %318 = vector.broadcast %5 : vector<1x128xf32> to vector<2x128xf32>
    %319 = arith.addf %317, %318 : vector<2x128xf32>
    %cst_80 = arith.constant dense<0xFF800000> : vector<2xf32>
    %320 = vector.multi_reduction <maximumf>, %319, %cst_80 [1] : vector<2x128xf32> to vector<2xf32>
    %321 = vector.shape_cast %320 : vector<2xf32> to vector<2x1xf32>
    %322 = vector.broadcast %321 : vector<2x1xf32> to vector<2x128xf32>
    %323 = arith.subf %319, %322 : vector<2x128xf32>
    %324 = math.exp %323 : vector<2x128xf32>
    %cst_81 = arith.constant dense<0.000000e+00> : vector<2xf32>
    %325 = vector.multi_reduction <add>, %324, %cst_81 [1] : vector<2x128xf32> to vector<2xf32>
    %326 = vector.shape_cast %325 : vector<2xf32> to vector<2x1xf32>
    %327 = math.log %326 : vector<2x1xf32>
    %328 = vector.broadcast %327 : vector<2x1xf32> to vector<2x128xf32>
    %329 = arith.subf %323, %328 : vector<2x128xf32>
    %330 = arith.index_cast %c5_i32 : i32 to index
    %c0_82 = arith.constant 0 : index
    %c0_83 = arith.constant 0 : index
    %331 = vector.load %arg7[%330, %c0_82, %c0_83] : memref<8x2x128xf32, #tpu.memory_space<vmem>>, vector<1x2x128xf32>
    %332 = vector.shape_cast %331 : vector<1x2x128xf32> to vector<2x128xf32>
    %333 = vector.shape_cast %329 : vector<2x128xf32> to vector<1x2x128xf32>
    tpu.vector_store %arg7[%330, %c0_82, %c0_83], %333 {strides = array<i32>} : memref<8x2x128xf32, #tpu.memory_space<vmem>>, vector<1x2x128xf32>,
    %334 = arith.select %314, %311, %280 : vector<2x32xi1>, vector<2x32xf32>
    %335 = arith.select %314, %309, %281 : vector<2x32xi1>, vector<2x32xf32>
    %c6_i32 = arith.constant 6 : i32
    %336 = arith.index_cast %c6_i32 : i32 to index
    %c0_84 = arith.constant 0 : index
    %c0_85 = arith.constant 0 : index
    %337 = vector.load %arg3[%336, %c0_84, %c0_85] : memref<8x2x128xf32, #tpu.memory_space<vmem>>, vector<1x2x128xf32>
    %338 = vector.shape_cast %337 : vector<1x2x128xf32> to vector<2x128xf32>
    %cst_86 = arith.constant dense<0.000000e+00> : vector<2x128xf32>
    %339 = tpu.matmul %334, %3, %cst_86 {dimension_numbers = #tpu.dot_dimension_numbers<[1], [0], [0], [1], [0, 0, 1, 1], [], []>} : vector<2x32xf32>, vector<32x128xf32>, vector<2x128xf32> -> vector<2x128xf32>
    %340 = arith.addf %338, %339 : vector<2x128xf32>
    %341 = vector.extract_strided_slice %340 {offsets = [0, 0], sizes = [2, 32], strides = [1, 1]} : vector<2x128xf32> to vector<2x32xf32>
    %342 = arith.negf %341 : vector<2x32xf32>
    %343 = math.exp %342 : vector<2x32xf32>
    %cst_87 = arith.constant 1.000000e+00 : f32
    %344 = vector.broadcast %cst_87 : f32 to vector<2x32xf32>
    %345 = arith.addf %344, %343 : vector<2x32xf32>
    %346 = arith.divf %344, %345 : vector<2x32xf32>
    %347 = vector.extract_strided_slice %340 {offsets = [0, 32], sizes = [2, 32], strides = [1, 1]} : vector<2x128xf32> to vector<2x32xf32>
    %348 = arith.negf %347 : vector<2x32xf32>
    %349 = math.exp %348 : vector<2x32xf32>
    %cst_88 = arith.constant 1.000000e+00 : f32
    %350 = vector.broadcast %cst_88 : f32 to vector<2x32xf32>
    %351 = arith.addf %350, %349 : vector<2x32xf32>
    %352 = arith.divf %350, %351 : vector<2x32xf32>
    %353 = vector.extract_strided_slice %340 {offsets = [0, 64], sizes = [2, 32], strides = [1, 1]} : vector<2x128xf32> to vector<2x32xf32>
    %354 = math.tanh %353 : vector<2x32xf32>
    %355 = vector.extract_strided_slice %340 {offsets = [0, 96], sizes = [2, 32], strides = [1, 1]} : vector<2x128xf32> to vector<2x32xf32>
    %356 = arith.negf %355 : vector<2x32xf32>
    %357 = math.exp %356 : vector<2x32xf32>
    %cst_89 = arith.constant 1.000000e+00 : f32
    %358 = vector.broadcast %cst_89 : f32 to vector<2x32xf32>
    %359 = arith.addf %358, %357 : vector<2x32xf32>
    %360 = arith.divf %358, %359 : vector<2x32xf32>
    %361 = arith.mulf %352, %335 : vector<2x32xf32>
    %362 = arith.mulf %346, %354 : vector<2x32xf32>
    %363 = arith.addf %361, %362 : vector<2x32xf32>
    %364 = math.tanh %363 : vector<2x32xf32>
    %365 = arith.mulf %360, %364 : vector<2x32xf32>
    %366 = arith.addi %9, %c6_i32 : i32
    %367 = vector.broadcast %366 : i32 to vector<2x32xi32>
    %368 = arith.cmpi slt, %367, %8 : vector<2x32xi32>
    %cst_90 = arith.constant 0.000000e+00 : f32
    %369 = vector.broadcast %cst_90 : f32 to vector<2x32xf32>
    %370 = arith.select %368, %365, %369 : vector<2x32xi1>, vector<2x32xf32>
    %cst_91 = arith.constant dense<0.000000e+00> : vector<2x128xf32>
    %371 = tpu.matmul %370, %4, %cst_91 {dimension_numbers = #tpu.dot_dimension_numbers<[1], [0], [0], [1], [0, 0, 1, 1], [], []>} : vector<2x32xf32>, vector<32x128xf32>, vector<2x128xf32> -> vector<2x128xf32>
    %372 = vector.broadcast %5 : vector<1x128xf32> to vector<2x128xf32>
    %373 = arith.addf %371, %372 : vector<2x128xf32>
    %cst_92 = arith.constant dense<0xFF800000> : vector<2xf32>
    %374 = vector.multi_reduction <maximumf>, %373, %cst_92 [1] : vector<2x128xf32> to vector<2xf32>
    %375 = vector.shape_cast %374 : vector<2xf32> to vector<2x1xf32>
    %376 = vector.broadcast %375 : vector<2x1xf32> to vector<2x128xf32>
    %377 = arith.subf %373, %376 : vector<2x128xf32>
    %378 = math.exp %377 : vector<2x128xf32>
    %cst_93 = arith.constant dense<0.000000e+00> : vector<2xf32>
    %379 = vector.multi_reduction <add>, %378, %cst_93 [1] : vector<2x128xf32> to vector<2xf32>
    %380 = vector.shape_cast %379 : vector<2xf32> to vector<2x1xf32>
    %381 = math.log %380 : vector<2x1xf32>
    %382 = vector.broadcast %381 : vector<2x1xf32> to vector<2x128xf32>
    %383 = arith.subf %377, %382 : vector<2x128xf32>
    %384 = arith.index_cast %c6_i32 : i32 to index
    %c0_94 = arith.constant 0 : index
    %c0_95 = arith.constant 0 : index
    %385 = vector.load %arg7[%384, %c0_94, %c0_95] : memref<8x2x128xf32, #tpu.memory_space<vmem>>, vector<1x2x128xf32>
    %386 = vector.shape_cast %385 : vector<1x2x128xf32> to vector<2x128xf32>
    %387 = vector.shape_cast %383 : vector<2x128xf32> to vector<1x2x128xf32>
    tpu.vector_store %arg7[%384, %c0_94, %c0_95], %387 {strides = array<i32>} : memref<8x2x128xf32, #tpu.memory_space<vmem>>, vector<1x2x128xf32>,
    %388 = arith.select %368, %365, %334 : vector<2x32xi1>, vector<2x32xf32>
    %389 = arith.select %368, %363, %335 : vector<2x32xi1>, vector<2x32xf32>
    %c7_i32 = arith.constant 7 : i32
    %390 = arith.index_cast %c7_i32 : i32 to index
    %c0_96 = arith.constant 0 : index
    %c0_97 = arith.constant 0 : index
    %391 = vector.load %arg3[%390, %c0_96, %c0_97] : memref<8x2x128xf32, #tpu.memory_space<vmem>>, vector<1x2x128xf32>
    %392 = vector.shape_cast %391 : vector<1x2x128xf32> to vector<2x128xf32>
    %cst_98 = arith.constant dense<0.000000e+00> : vector<2x128xf32>
    %393 = tpu.matmul %388, %3, %cst_98 {dimension_numbers = #tpu.dot_dimension_numbers<[1], [0], [0], [1], [0, 0, 1, 1], [], []>} : vector<2x32xf32>, vector<32x128xf32>, vector<2x128xf32> -> vector<2x128xf32>
    %394 = arith.addf %392, %393 : vector<2x128xf32>
    %395 = vector.extract_strided_slice %394 {offsets = [0, 0], sizes = [2, 32], strides = [1, 1]} : vector<2x128xf32> to vector<2x32xf32>
    %396 = arith.negf %395 : vector<2x32xf32>
    %397 = math.exp %396 : vector<2x32xf32>
    %cst_99 = arith.constant 1.000000e+00 : f32
    %398 = vector.broadcast %cst_99 : f32 to vector<2x32xf32>
    %399 = arith.addf %398, %397 : vector<2x32xf32>
    %400 = arith.divf %398, %399 : vector<2x32xf32>
    %401 = vector.extract_strided_slice %394 {offsets = [0, 32], sizes = [2, 32], strides = [1, 1]} : vector<2x128xf32> to vector<2x32xf32>
    %402 = arith.negf %401 : vector<2x32xf32>
    %403 = math.exp %402 : vector<2x32xf32>
    %cst_100 = arith.constant 1.000000e+00 : f32
    %404 = vector.broadcast %cst_100 : f32 to vector<2x32xf32>
    %405 = arith.addf %404, %403 : vector<2x32xf32>
    %406 = arith.divf %404, %405 : vector<2x32xf32>
    %407 = vector.extract_strided_slice %394 {offsets = [0, 64], sizes = [2, 32], strides = [1, 1]} : vector<2x128xf32> to vector<2x32xf32>
    %408 = math.tanh %407 : vector<2x32xf32>
    %409 = vector.extract_strided_slice %394 {offsets = [0, 96], sizes = [2, 32], strides = [1, 1]} : vector<2x128xf32> to vector<2x32xf32>
    %410 = arith.negf %409 : vector<2x32xf32>
    %411 = math.exp %410 : vector<2x32xf32>
    %cst_101 = arith.constant 1.000000e+00 : f32
    %412 = vector.broadcast %cst_101 : f32 to vector<2x32xf32>
    %413 = arith.addf %412, %411 : vector<2x32xf32>
    %414 = arith.divf %412, %413 : vector<2x32xf32>
    %415 = arith.mulf %406, %389 : vector<2x32xf32>
    %416 = arith.mulf %400, %408 : vector<2x32xf32>
    %417 = arith.addf %415, %416 : vector<2x32xf32>
    %418 = math.tanh %417 : vector<2x32xf32>
    %419 = arith.mulf %414, %418 : vector<2x32xf32>
    %420 = arith.addi %9, %c7_i32 : i32
    %421 = vector.broadcast %420 : i32 to vector<2x32xi32>
    %422 = arith.cmpi slt, %421, %8 : vector<2x32xi32>
    %cst_102 = arith.constant 0.000000e+00 : f32
    %423 = vector.broadcast %cst_102 : f32 to vector<2x32xf32>
    %424 = arith.select %422, %419, %423 : vector<2x32xi1>, vector<2x32xf32>
    %cst_103 = arith.constant dense<0.000000e+00> : vector<2x128xf32>
    %425 = tpu.matmul %424, %4, %cst_103 {dimension_numbers = #tpu.dot_dimension_numbers<[1], [0], [0], [1], [0, 0, 1, 1], [], []>} : vector<2x32xf32>, vector<32x128xf32>, vector<2x128xf32> -> vector<2x128xf32>
    %426 = vector.broadcast %5 : vector<1x128xf32> to vector<2x128xf32>
    %427 = arith.addf %425, %426 : vector<2x128xf32>
    %cst_104 = arith.constant dense<0xFF800000> : vector<2xf32>
    %428 = vector.multi_reduction <maximumf>, %427, %cst_104 [1] : vector<2x128xf32> to vector<2xf32>
    %429 = vector.shape_cast %428 : vector<2xf32> to vector<2x1xf32>
    %430 = vector.broadcast %429 : vector<2x1xf32> to vector<2x128xf32>
    %431 = arith.subf %427, %430 : vector<2x128xf32>
    %432 = math.exp %431 : vector<2x128xf32>
    %cst_105 = arith.constant dense<0.000000e+00> : vector<2xf32>
    %433 = vector.multi_reduction <add>, %432, %cst_105 [1] : vector<2x128xf32> to vector<2xf32>
    %434 = vector.shape_cast %433 : vector<2xf32> to vector<2x1xf32>
    %435 = math.log %434 : vector<2x1xf32>
    %436 = vector.broadcast %435 : vector<2x1xf32> to vector<2x128xf32>
    %437 = arith.subf %431, %436 : vector<2x128xf32>
    %438 = arith.index_cast %c7_i32 : i32 to index
    %c0_106 = arith.constant 0 : index
    %c0_107 = arith.constant 0 : index
    %439 = vector.load %arg7[%438, %c0_106, %c0_107] : memref<8x2x128xf32, #tpu.memory_space<vmem>>, vector<1x2x128xf32>
    %440 = vector.shape_cast %439 : vector<1x2x128xf32> to vector<2x128xf32>
    %441 = vector.shape_cast %437 : vector<2x128xf32> to vector<1x2x128xf32>
    tpu.vector_store %arg7[%438, %c0_106, %c0_107], %441 {strides = array<i32>} : memref<8x2x128xf32, #tpu.memory_space<vmem>>, vector<1x2x128xf32>,
    %442 = arith.select %422, %419, %388 : vector<2x32xi1>, vector<2x32xf32>
    %443 = arith.select %422, %417, %389 : vector<2x32xi1>, vector<2x32xf32>
    %c8_i32_108 = arith.constant 8 : i32
    %c0_109 = arith.constant 0 : index
    %c0_110 = arith.constant 0 : index
    %444 = vector.load %arg8[%c0_109, %c0_110] : memref<2x32xf32, #tpu.memory_space<vmem>>, vector<2x32xf32>
    tpu.vector_store %arg8[%c0_109, %c0_110], %442 {strides = array<i32>} : memref<2x32xf32, #tpu.memory_space<vmem>>, vector<2x32xf32>,
    %c0_111 = arith.constant 0 : index
    %c0_112 = arith.constant 0 : index
    %445 = vector.load %arg9[%c0_111, %c0_112] : memref<2x32xf32, #tpu.memory_space<vmem>>, vector<2x32xf32>
    tpu.vector_store %arg9[%c0_111, %c0_112], %443 {strides = array<i32>} : memref<2x32xf32, #tpu.memory_space<vmem>>, vector<2x32xf32>,
    return
  }
  func.func @transform_0(%arg0: i32, %arg1: i32) -> (i32, i32) {
    %c0_i32 = arith.constant 0 : i32
    %c0_i32_0 = arith.constant 0 : i32
    return %arg0, %c0_i32 : i32, i32
  }
  func.func @transform_1(%arg0: i32, %arg1: i32) -> (i32, i32, i32) {
    %c0_i32 = arith.constant 0 : i32
    %c0_i32_0 = arith.constant 0 : i32
    return %arg1, %arg0, %c0_i32 : i32, i32, i32
  }
  func.func @transform_2(%arg0: i32, %arg1: i32) -> (i32, i32) {
    %c0_i32 = arith.constant 0 : i32
    %c0_i32_0 = arith.constant 0 : i32
    %c0_i32_1 = arith.constant 0 : i32
    return %c0_i32, %c0_i32_0 : i32, i32
  }
  func.func @transform_3(%arg0: i32, %arg1: i32) -> (i32, i32) {
    %c0_i32 = arith.constant 0 : i32
    %c0_i32_0 = arith.constant 0 : i32
    %c0_i32_1 = arith.constant 0 : i32
    return %c0_i32, %c0_i32_0 : i32, i32
  }
  func.func @transform_4(%arg0: i32, %arg1: i32) -> (i32, i32) {
    %c0_i32 = arith.constant 0 : i32
    %c0_i32_0 = arith.constant 0 : i32
    %c0_i32_1 = arith.constant 0 : i32
    return %c0_i32, %c0_i32_0 : i32, i32
  }
  func.func @transform_5(%arg0: i32, %arg1: i32) -> (i32, i32, i32) {
    %c0_i32 = arith.constant 0 : i32
    %c0_i32_0 = arith.constant 0 : i32
    return %arg1, %arg0, %c0_i32 : i32, i32, i32
  }
}

</mosaic_0001>

<bundles_post_ra>
// kernel: tpu_custom_call.1
= control target key start
LH: loop header
LB: loop body
LE: loop exit
PB: predicated region body
PF: predicated region fallthrough
CT: control target
= control target key end

     0   :  { %10 = vsyncpa [#allocation5], 0  ;;  %s1599_s0 = inlined_call_operand.vmem [shape: s32[2,1], index: 0, kind: input, shape index: {}]   ;;  %s1600_s1 = inlined_call_operand.hbm [shape: f32[8,2,128], index: 1, kind: input, shape index: {}]   ;;  %s1601_s2 = inlined_call_operand.hbm [shape: f32[32,128], index: 2, kind: input, shape index: {}]   ;;  %s1602_s3 = inlined_call_operand.hbm [shape: f32[32,128], index: 3, kind: input, shape index: {}]   ;;  %s1603_s4 = inlined_call_operand.vmem [shape: f32[1,128], index: 4, kind: input, shape index: {}]   ;;  %s1604_s5 = inlined_call_operand.hbm [shape: f32[8,2,128], index: 5, kind: output, shape index: {}]  }
   0x1   :  { %11 = vsyncpa [#allocation8], 0  ;;  %s32_s20 = sshll.u32 %s1601_s2, 4  ;;  %s33_s20 = int_to_ptr.hbm [resolvable:$true] %s32_s20 }
   0x2   :  { %12 = vsyncpa [#allocation6], 0  ;;  %s1254_s21 = smov [#allocation7]   ;;  %s19_s25 = sshll.u32 %s1600_s1, 4  ;;  %s20_s25 = int_to_ptr.hbm [resolvable:$true] %s19_s25 }
   0x3   :  { %s34_s22 = sshll.u32 %s1254_s21, 4  ;;  %s1255_s26 = smov 128   ;;  %s35_s22 = int_to_ptr.vmem [resolvable:$true] %s34_s22 }
   0x4   :  { %s1256_s27 = smov 8   ;;  %s1257_s28 = smov [#allocation4]  }
   0x5   :  { %40 = dma.hbm_to_vmem [thread:$0]  %s33_s20, 512, %s35_s22, [#allocation8], %s1255_s26, %s1255_s26, %s1256_s27  }
   0x6   :  { %s21_s29 = sshll.u32 %s1257_s28, 4  ;;  %s1258_s30 = smov 32   ;;  %s22_s29 = int_to_ptr.vmem [resolvable:$true] %s21_s29 }
   0x7   :  { %s1259_s6 = smov 2   ;;  %s45_s8 = sshll.u32 %s1602_s3, 4  ;;  %s46_s8 = int_to_ptr.hbm [resolvable:$true] %s45_s8 }
   0x8   :  { %27 = dma.hbm_to_vmem [thread:$0]  %s20_s25, 256, %s22_s29, [#allocation5], %s1258_s30, %s1258_s30, %s1259_s6  }
   0x9   :  { %s1260_s9 = smov [#allocation9]  }
   0xa   :  { %s47_s1 = sshll.u32 %s1260_s9, 4  ;;  %s48_s1 = int_to_ptr.vmem [resolvable:$true] %s47_s1 }
   0xb   :  { %53 = dma.hbm_to_vmem [thread:$0]  %s46_s8, 512, %s48_s1, [#allocation8], %s1255_s26, %s1255_s26, %s1256_s27  }
   0xc   :  { %1248 = dma.done.wait [#allocation5], 256  }
   0xd   :  { %1249 = vsyncadd [#allocation5], 4294967040 }
   0xe   :  { %1250 = dma.done.wait [#allocation8], 1024  }
   0xf   :  { %1251 = vsyncadd [#allocation8], 4294966272  ;;  %vm72_vm0 = vcmask 254976   ;;  %v1261_v0 = vmov 0.0   ;;  %v1310_v1 = vld [vmem:[#allocation7 + $0x18] sm:$0xff]  ;;  %v1312_v2 = vld [vmem:[#allocation7 + $0x10] sm:$0xff] }
  0x10   :  { %73 = vst.msk [vmem:[#allocation2] sm:$0x3] %vm72_vm0, %v1261_v0  ;;  %108 = vmatpush.msra.mxu0 %v1310_v1  ;;  %227 = vmatpush.msra.mxu2 %v1310_v1  ;;  %v1316_v3 = vld [vmem:[#allocation7 + $0x8] sm:$0xff]  ;;  %v1320_v4 = vld [vmem:[#allocation7] sm:$0xff]  ;;  %vm92_vm1 = vcmask 261120   ;;  %s1262_s3 = smov 64  }
  0x11   :  { %74 = vst.msk [vmem:[#allocation3] sm:$0x3] %vm72_vm0, %v1261_v0  ;;  %v91_v6 = vld [vmem:[#allocation4] sm:$0x3]  ;;  %v84_v14 = vld [vmem:[%s1599_s0] sm:$0x3] }
  0x12   :  { %109 = vmatpush.msra.mxu0 %v1312_v2  ;;  %228 = vmatpush.msra.mxu2 %v1312_v2  ;;  %v1263_v16 = vmov 0   ;;  %s1264_s0 = smov 96   ;;  %v209_v39 = vld [vmem:[#allocation4 + $0x2] sm:$0x3]  ;;  %s995_s17 = sshll.u32 %s1604_s5, 4  ;;  %s996_s17 = int_to_ptr.hbm [resolvable:$true] %s995_s17 }
  0x13   :  { %1053 = vset.pattern.permute.xlu2 %v1263_v16  ;;  %1054 = vset.pattern.permute.xlu0 %v1263_v16 }
  0x14   :  { %110 = vmatpush.msra.mxu0 %v1316_v3  ;;  %229 = vmatpush.msra.mxu2 %v1316_v3 }
  0x15   :  { %86 = vperm.xlu2 %1053, %v84_v14  }
  0x16   :  { %111 = vmatpush.msra.mxu0 %v1320_v4  ;;  %230 = vmatpush.msra.mxu2 %v1320_v4 }
  0x17   :  { %v89_v5 = vld [vmem:[#allocation2] sm:$0x3] }
  0x18   :  { %1009 = vmatmul.msk.f32.vlgmr.msra.gmra.mxu0 %vm92_vm1, %v89_v5  ;;  %447 = vmatpush.msrb.mxu2 %v1310_v1  ;;  %v90_v10 = vld [vmem:[#allocation3] sm:$0x3] }
  0x19   :  { %337 = vmatpush.msrb.mxu0 %v1310_v1 }
  0x1a   :  { %448 = vmatpush.msrb.mxu2 %v1312_v2 }
  0x1b   :  { %338 = vmatpush.msrb.mxu0 %v1312_v2 }
  0x1c   :  { %449 = vmatpush.msrb.mxu2 %v1316_v3 }
  0x1d   :  { %339 = vmatpush.msrb.mxu0 %v1316_v3  ;;  %203 = vrot.lane.b32.xlu2 %v89_v5, %s1264_s0 }
  0x1e   :  { %450 = vmatpush.msrb.mxu2 %v1320_v4 }
  0x1f   :  { %340 = vmatpush.msrb.mxu0 %v1320_v4 }
  0x21   :  { %557 = vmatpush.msra.mxu0 %v1310_v1 }
  0x23   :  { %558 = vmatpush.msra.mxu0 %v1312_v2 }
  0x25   :  { %559 = vmatpush.msra.mxu0 %v1316_v3 }
  0x27   :  { %560 = vmatpush.msra.mxu0 %v1320_v4 }
  0x6f   :  { %v1347_v33 = vpop.permute.xlu2 %86 }
  0x70   :  { %vm1011_vm6 = vcmp.gt.s32.totalorder %v1347_v33, 0  ;;  %vm1015_vm11 = vcmp.gt.s32.totalorder %v1347_v33, 1 }
  0x77   :  { %v204_v35 = vpop.permute.xlu2 %203 }
  0x95   :  { %v113_v7 = vpop.f32.mrf.mxu0 }
  0x96   :  { %v116_v8 = vadd.f32 %v113_v7, %v91_v6  ;;  %v319_v7 = vld [vmem:[#allocation4 + $0x4] sm:$0x3] }
  0x98   :  { %1056 = vtanh.f32 %v116_v8  ;;  %v1010_v11 = vmul.f32 -1.442695, %v116_v8 }
  0x9a   :  { %1058 = vpow2.f32 %v1010_v11 }
  0x9e   :  { %v1057_v9 = vpop.eup %1056 }
  0x9f   :  { %143 = vrot.lane.b32.xlu0 %v1057_v9, %s1262_s3 }
  0xa0   :  { %v1059_v12 = vpop.eup %1058 }
  0xa1   :  { %v120_v13 = vadd.f32 1.0, %v1059_v12 }
  0xa3   :  { %1060 = vrcp.f32 %v120_v13  ;;  %v132_v21 = vand.u32 2147483648, %v120_v13  ;;  %vm126_vm3 = vweird.f32 %v120_v13  ;;  %v130_v22 = vand.u32 2147483647, %v120_v13 }
  0xa5   :  { %v133_v24 = vor.u32 1.1754944e-38, %v132_v21  ;;  %vm131_vm5 = vcmp.eq.f32.partialorder %v130_v22, 8.507059e+37 }
  0xa7   :  { %138 = vrot.lane.b32.xlu0 %v90_v10, %s1258_s30 }
  0xa9   :  { %v1061_v15 = vpop.eup %1060 }
  0xaa   :  { %v122_v17 = vmul.f32 %v1061_v15, %v120_v13  ;;  %vm127_vm2 = vweird.f32 %v1061_v15 }
  0xab   :  { %vm128_vm4 = vmor %vm126_vm3, %vm127_vm2  ;;  %vm1019_vm2 = vcmp.gt.s32.totalorder %v1347_v33, 2 }
  0xac   :  { %v123_v18 = vsub.f32 1.0, %v122_v17 }
  0xae   :  { %v124_v19 = vmul.f32 %v1061_v15, %v123_v18 }
  0xb0   :  { %v125_v20 = vadd.f32 %v1061_v15, %v124_v19 }
  0xb2   :  { %v129_v23 = vsel %vm128_vm4, %v1061_v15, %v125_v20 }
  0xb3   :  { %v134_v26 = vsel %vm131_vm5, %v133_v24, %v129_v23 }
 0x111   :  { %v144_v25 = vpop.permute.xlu0 %143 }
 0x112   :  { %v146_v27 = vmul.f32 %v144_v25, %v134_v26 }
 0x114   :  { %148 = vrot.lane.b32.xlu1 %v146_v27, %s1258_s30 }
 0x119   :  { %v139_v28 = vpop.permute.xlu0 %138 }
 0x11a   :  { %v141_v29 = vmul.f32 %v139_v28, %v134_v26 }
 0x186   :  { %v149_v30 = vpop.permute.xlu1 %148 }
 0x187   :  { %v151_v31 = vadd.f32 %v149_v30, %v141_v29 }
 0x189   :  { %1062 = vtanh.f32 %v151_v31  ;;  %v207_v58 = vsel %vm1011_vm6, %v151_v31, %v139_v28 }
 0x18f   :  { %v1063_v32 = vpop.eup %1062 }
 0x190   :  { %154 = vrot.lane.b32.xlu1 %v1063_v32, %s1262_s3 }
 0x202   :  { %v155_v34 = vpop.permute.xlu1 %154 }
 0x203   :  { %v1349_v36 = vmul.f32 %v155_v34, %v134_v26 }
 0x205   :  { %v206_v37 = vsel %vm1011_vm6, %v1349_v36, %v204_v35 }
 0x206   :  { %211 = vrot.lane.b32.xlu0 %v206_v37, %s1258_s30 }
 0x278   :  { %v212_v38 = vpop.permute.xlu0 %211 }
 0x279   :  { %1013 = vmatmul.msk.f32.vlgmr.msra.gmra.mxu2 %vm92_vm1, %v212_v38 }
 0x27a   :  { %667 = vmatpush.msra.mxu2 %v1310_v1 }
 0x27c   :  { %668 = vmatpush.msra.mxu2 %v1312_v2 }
 0x27e   :  { %669 = vmatpush.msra.mxu2 %v1316_v3 }
 0x280   :  { %670 = vmatpush.msra.mxu2 %v1320_v4 }
 0x2fc   :  { %v232_v40 = vpop.f32.mrf.mxu2 }
 0x2fd   :  { %v235_v41 = vadd.f32 %v232_v40, %v209_v39 }
 0x2ff   :  { %1064 = vtanh.f32 %v235_v41  ;;  %v1014_v43 = vmul.f32 -1.442695, %v235_v41 }
 0x301   :  { %1066 = vpow2.f32 %v1014_v43 }
 0x305   :  { %v1065_v42 = vpop.eup %1064 }
 0x306   :  { %258 = vrot.lane.b32.xlu1 %v1065_v42, %s1262_s3 }
 0x307   :  { %v1067_v44 = vpop.eup %1066 }
 0x308   :  { %v239_v45 = vadd.f32 1.0, %v1067_v44 }
 0x30a   :  { %1068 = vrcp.f32 %v239_v45  ;;  %v251_v51 = vand.u32 2147483648, %v239_v45  ;;  %vm245_vm8 = vweird.f32 %v239_v45  ;;  %v249_v52 = vand.u32 2147483647, %v239_v45 }
 0x30c   :  { %v252_v54 = vor.u32 1.1754944e-38, %v251_v51  ;;  %vm250_vm10 = vcmp.eq.f32.partialorder %v249_v52, 8.507059e+37 }
 0x310   :  { %v1069_v46 = vpop.eup %1068 }
 0x311   :  { %v241_v47 = vmul.f32 %v1069_v46, %v239_v45  ;;  %vm246_vm7 = vweird.f32 %v1069_v46 }
 0x312   :  { %vm247_vm9 = vmor %vm245_vm8, %vm246_vm7  ;;  %vm1023_vm8 = vcmp.gt.s32.totalorder %v1347_v33, 3 }
 0x313   :  { %v242_v48 = vsub.f32 1.0, %v241_v47 }
 0x315   :  { %v243_v49 = vmul.f32 %v1069_v46, %v242_v48 }
 0x317   :  { %v244_v50 = vadd.f32 %v1069_v46, %v243_v49 }
 0x319   :  { %v248_v53 = vsel %vm247_vm9, %v1069_v46, %v244_v50 }
 0x31a   :  { %v253_v56 = vsel %vm250_vm10, %v252_v54, %v248_v53 }
 0x31b   :  { %v256_v59 = vmul.f32 %v253_v56, %v207_v58 }
 0x378   :  { %v259_v55 = vpop.permute.xlu1 %258 }
 0x379   :  { %v261_v57 = vmul.f32 %v259_v55, %v253_v56 }
 0x37b   :  { %263 = vrot.lane.b32.xlu2 %v261_v57, %s1258_s30 }
 0x3d5   :  { %v264_v60 = vpop.permute.xlu2 %263 }
 0x3d6   :  { %v266_v61 = vadd.f32 %v264_v60, %v256_v59 }
 0x3d8   :  { %1070 = vtanh.f32 %v266_v61  ;;  %v317_v26 = vsel %vm1015_vm11, %v266_v61, %v207_v58  ;;  %v539_v61 = vld [vmem:[#allocation4 + $0x8] sm:$0x3] }
 0x3de   :  { %v1071_v62 = vpop.eup %1070 }
 0x3df   :  { %269 = vrot.lane.b32.xlu0 %v1071_v62, %s1262_s3 }
 0x451   :  { %v270_v63 = vpop.permute.xlu0 %269 }
 0x452   :  { %v1366_v0 = vmul.f32 %v270_v63, %v253_v56 }
 0x454   :  { %v316_v5 = vsel %vm1015_vm11, %v1366_v0, %v206_v37  ;;  %v429_v37 = vld [vmem:[#allocation4 + $0x6] sm:$0x3] }
 0x455   :  { %321 = vrot.lane.b32.xlu1 %v316_v5, %s1258_s30 }
 0x4c7   :  { %v322_v6 = vpop.permute.xlu1 %321 }
 0x4c8   :  { %1017 = vmatmul.msk.f32.vlgmr.msrb.gmra.mxu0 %vm92_vm1, %v322_v6 }
 0x4c9   :  { %777 = vmatpush.msrb.mxu0 %v1310_v1 }
 0x4cb   :  { %778 = vmatpush.msrb.mxu0 %v1312_v2 }
 0x4cd   :  { %779 = vmatpush.msrb.mxu0 %v1316_v3 }
 0x4cf   :  { %780 = vmatpush.msrb.mxu0 %v1320_v4 }
 0x545   :  { %v342_v8 = vpop.f32.mrf.mxu0 }
 0x546   :  { %v345_v9 = vadd.f32 %v342_v8, %v319_v7 }
 0x548   :  { %1072 = vtanh.f32 %v345_v9  ;;  %v1018_v11 = vmul.f32 -1.442695, %v345_v9 }
 0x54a   :  { %1074 = vpow2.f32 %v1018_v11 }
 0x54e   :  { %v1073_v10 = vpop.eup %1072 }
 0x54f   :  { %368 = vrot.lane.b32.xlu2 %v1073_v10, %s1262_s3 }
 0x550   :  { %v1075_v12 = vpop.eup %1074 }
 0x551   :  { %v349_v13 = vadd.f32 1.0, %v1075_v12 }
 0x553   :  { %1076 = vrcp.f32 %v349_v13  ;;  %v361_v19 = vand.u32 2147483648, %v349_v13  ;;  %vm355_vm13 = vweird.f32 %v349_v13  ;;  %v359_v20 = vand.u32 2147483647, %v349_v13 }
 0x555   :  { %v362_v22 = vor.u32 1.1754944e-38, %v361_v19  ;;  %vm360_vm15 = vcmp.eq.f32.partialorder %v359_v20, 8.507059e+37 }
 0x559   :  { %v1077_v14 = vpop.eup %1076 }
 0x55a   :  { %v351_v15 = vmul.f32 %v1077_v14, %v349_v13  ;;  %vm356_vm12 = vweird.f32 %v1077_v14 }
 0x55b   :  { %vm357_vm14 = vmor %vm355_vm13, %vm356_vm12 }
 0x55c   :  { %v352_v16 = vsub.f32 1.0, %v351_v15 }
 0x55e   :  { %v353_v17 = vmul.f32 %v1077_v14, %v352_v16 }
 0x560   :  { %v354_v18 = vadd.f32 %v1077_v14, %v353_v17 }
 0x562   :  { %v358_v21 = vsel %vm357_vm14, %v1077_v14, %v354_v18  ;;  %vm1027_vm14 = vcmp.gt.s32.totalorder %v1347_v33, 4 }
 0x563   :  { %v363_v24 = vsel %vm360_vm15, %v362_v22, %v358_v21 }
 0x564   :  { %v366_v27 = vmul.f32 %v363_v24, %v317_v26 }
 0x5a9   :  { %v369_v23 = vpop.permute.xlu2 %368 }
 0x5aa   :  { %v371_v25 = vmul.f32 %v369_v23, %v363_v24 }
 0x5ac   :  { %373 = vrot.lane.b32.xlu0 %v371_v25, %s1258_s30 }
 0x61e   :  { %v374_v28 = vpop.permute.xlu0 %373 }
 0x61f   :  { %v376_v29 = vadd.f32 %v374_v28, %v366_v27 }
 0x621   :  { %1078 = vtanh.f32 %v376_v29  ;;  %v427_v52 = vsel %vm1019_vm2, %v376_v29, %v317_v26 }
 0x627   :  { %v1079_v30 = vpop.eup %1078 }
 0x628   :  { %379 = vrot.lane.b32.xlu1 %v1079_v30, %s1262_s3  ;;  %v649_v30 = vld [vmem:[#allocation4 + $0xa] sm:$0x3] }
 0x69a   :  { %v380_v31 = vpop.permute.xlu1 %379 }
 0x69b   :  { %v1383_v32 = vmul.f32 %v380_v31, %v363_v24 }
 0x69d   :  { %v426_v34 = vsel %vm1019_vm2, %v1383_v32, %v316_v5 }
 0x69e   :  { %431 = vrot.lane.b32.xlu2 %v426_v34, %s1258_s30 }
 0x6f8   :  { %v432_v35 = vpop.permute.xlu2 %431 }
 0x6f9   :  { %1021 = vmatmul.msk.f32.vlgmr.msrb.gmra.mxu2 %vm92_vm1, %v432_v35 }
 0x6fa   :  { %887 = vmatpush.msrb.mxu2 %v1310_v1 }
 0x6fc   :  { %888 = vmatpush.msrb.mxu2 %v1312_v2 }
 0x6fe   :  { %889 = vmatpush.msrb.mxu2 %v1316_v3 }
 0x700   :  { %890 = vmatpush.msrb.mxu2 %v1320_v4 }
 0x77c   :  { %v452_v38 = vpop.f32.mrf.mxu2 }
 0x77d   :  { %v455_v39 = vadd.f32 %v452_v38, %v429_v37 }
 0x77f   :  { %1080 = vtanh.f32 %v455_v39  ;;  %v1022_v41 = vmul.f32 -1.442695, %v455_v39 }
 0x781   :  { %1082 = vpow2.f32 %v1022_v41 }
 0x785   :  { %v1081_v40 = vpop.eup %1080 }
 0x786   :  { %478 = vrot.lane.b32.xlu0 %v1081_v40, %s1262_s3 }
 0x787   :  { %v1083_v42 = vpop.eup %1082 }
 0x788   :  { %v459_v43 = vadd.f32 1.0, %v1083_v42 }
 0x78a   :  { %1084 = vrcp.f32 %v459_v43  ;;  %v471_v3 = vand.u32 2147483648, %v459_v43  ;;  %vm465_vm4 = vweird.f32 %v459_v43  ;;  %v469_v4 = vand.u32 2147483647, %v459_v43 }
 0x78c   :  { %v472_v48 = vor.u32 1.1754944e-38, %v471_v3  ;;  %vm470_vm7 = vcmp.eq.f32.partialorder %v469_v4, 8.507059e+37 }
 0x790   :  { %v1085_v44 = vpop.eup %1084 }
 0x791   :  { %v461_v1 = vmul.f32 %v1085_v44, %v459_v43  ;;  %vm466_vm3 = vweird.f32 %v1085_v44 }
 0x792   :  { %vm467_vm5 = vmor %vm465_vm4, %vm466_vm3 }
 0x793   :  { %v462_v45 = vsub.f32 1.0, %v461_v1 }
 0x795   :  { %v463_v2 = vmul.f32 %v1085_v44, %v462_v45 }
 0x797   :  { %v464_v46 = vadd.f32 %v1085_v44, %v463_v2 }
 0x799   :  { %v468_v47 = vsel %vm467_vm5, %v1085_v44, %v464_v46 }
 0x79a   :  { %v473_v50 = vsel %vm470_vm7, %v472_v48, %v468_v47  ;;  %vm1031_vm7 = vcmp.gt.s32.totalorder %v1347_v33, 5 }
 0x79b   :  { %v476_v53 = vmul.f32 %v473_v50, %v427_v52 }
 0x7f8   :  { %v479_v49 = vpop.permute.xlu0 %478 }
 0x7f9   :  { %v481_v51 = vmul.f32 %v479_v49, %v473_v50 }
 0x7fb   :  { %483 = vrot.lane.b32.xlu1 %v481_v51, %s1258_s30 }
 0x86d   :  { %v484_v54 = vpop.permute.xlu1 %483 }
 0x86e   :  { %v486_v55 = vadd.f32 %v484_v54, %v476_v53 }
 0x870   :  { %1086 = vtanh.f32 %v486_v55  ;;  %v537_v21 = vsel %vm1023_vm8, %v486_v55, %v427_v52 }
 0x876   :  { %v1087_v56 = vpop.eup %1086 }
 0x877   :  { %489 = vrot.lane.b32.xlu2 %v1087_v56, %s1262_s3 }
 0x8d1   :  { %v490_v57 = vpop.permute.xlu2 %489 }
 0x8d2   :  { %v1400_v58 = vmul.f32 %v490_v57, %v473_v50  ;;  %v759_v57 = vld [vmem:[#allocation4 + $0xc] sm:$0x3] }
 0x8d4   :  { %v536_v59 = vsel %vm1023_vm8, %v1400_v58, %v426_v34 }
 0x8d5   :  { %541 = vrot.lane.b32.xlu0 %v536_v59, %s1258_s30 }
 0x947   :  { %v542_v60 = vpop.permute.xlu0 %541 }
 0x948   :  { %1025 = vmatmul.msk.f32.vlgmr.msra.gmra.mxu0 %vm92_vm1, %v542_v60 }
 0x9c5   :  { %v562_v62 = vpop.f32.mrf.mxu0 }
 0x9c6   :  { %v565_v63 = vadd.f32 %v562_v62, %v539_v61 }
 0x9c8   :  { %1088 = vtanh.f32 %v565_v63  ;;  %v1026_v6 = vmul.f32 -1.442695, %v565_v63 }
 0x9ca   :  { %1090 = vpow2.f32 %v1026_v6 }
 0x9ce   :  { %v1089_v5 = vpop.eup %1088 }
 0x9cf   :  { %588 = vrot.lane.b32.xlu1 %v1089_v5, %s1262_s3 }
 0x9d0   :  { %v1091_v7 = vpop.eup %1090 }
 0x9d1   :  { %v569_v8 = vadd.f32 1.0, %v1091_v7 }
 0x9d3   :  { %1092 = vrcp.f32 %v569_v8  ;;  %v581_v14 = vand.u32 2147483648, %v569_v8  ;;  %vm575_vm10 = vweird.f32 %v569_v8  ;;  %v579_v15 = vand.u32 2147483647, %v569_v8 }
 0x9d5   :  { %v582_v17 = vor.u32 1.1754944e-38, %v581_v14  ;;  %vm580_vm13 = vcmp.eq.f32.partialorder %v579_v15, 8.507059e+37 }
 0x9d9   :  { %v1093_v9 = vpop.eup %1092 }
 0x9da   :  { %v571_v10 = vmul.f32 %v1093_v9, %v569_v8  ;;  %vm576_vm9 = vweird.f32 %v1093_v9 }
 0x9db   :  { %vm577_vm12 = vmor %vm575_vm10, %vm576_vm9 }
 0x9dc   :  { %v572_v11 = vsub.f32 1.0, %v571_v10 }
 0x9de   :  { %v573_v12 = vmul.f32 %v1093_v9, %v572_v11 }
 0x9e0   :  { %v574_v13 = vadd.f32 %v1093_v9, %v573_v12 }
 0x9e2   :  { %v578_v16 = vsel %vm577_vm12, %v1093_v9, %v574_v13 }
 0x9e3   :  { %v583_v19 = vsel %vm580_vm13, %v582_v17, %v578_v16 }
 0x9e4   :  { %v586_v22 = vmul.f32 %v583_v19, %v537_v21 }
 0xa41   :  { %v589_v18 = vpop.permute.xlu1 %588 }
 0xa42   :  { %v591_v20 = vmul.f32 %v589_v18, %v583_v19 }
 0xa44   :  { %593 = vrot.lane.b32.xlu2 %v591_v20, %s1258_s30 }
 0xa9e   :  { %v594_v23 = vpop.permute.xlu2 %593 }
 0xa9f   :  { %v596_v24 = vadd.f32 %v594_v23, %v586_v22 }
 0xaa1   :  { %1094 = vtanh.f32 %v596_v24  ;;  %v647_v48 = vsel %vm1027_vm14, %v596_v24, %v537_v21 }
 0xaa7   :  { %v1095_v25 = vpop.eup %1094 }
 0xaa8   :  { %599 = vrot.lane.b32.xlu0 %v1095_v25, %s1262_s3 }
 0xb1a   :  { %v600_v26 = vpop.permute.xlu0 %599 }
 0xb1b   :  { %v1413_v27 = vmul.f32 %v600_v26, %v583_v19 }
 0xb1d   :  { %v646_v28 = vsel %vm1027_vm14, %v1413_v27, %v536_v59 }
 0xb1e   :  { %651 = vrot.lane.b32.xlu1 %v646_v28, %s1258_s30 }
 0xb90   :  { %v652_v29 = vpop.permute.xlu1 %651 }
 0xb91   :  { %1029 = vmatmul.msk.f32.vlgmr.msra.gmra.mxu2 %vm92_vm1, %v652_v29 }
 0xc14   :  { %v672_v31 = vpop.f32.mrf.mxu2 }
 0xc15   :  { %v675_v34 = vadd.f32 %v672_v31, %v649_v30 }
 0xc17   :  { %1096 = vtanh.f32 %v675_v34  ;;  %v1030_v37 = vmul.f32 -1.442695, %v675_v34  ;;  %v276_v34 = vsel %vm1015_vm11, %v1366_v0, 0.0  ;;  %v1471_v0 = vld [vmem:[#allocation9 + $0x8] sm:$0xff] }
 0xc19   :  { %1098 = vpow2.f32 %v1030_v37 }
 0xc1d   :  { %v1097_v35 = vpop.eup %1096 }
 0xc1e   :  { %698 = vrot.lane.b32.xlu2 %v1097_v35, %s1262_s3  ;;  %v386_v35 = vsel %vm1019_vm2, %v1383_v32, 0.0  ;;  %v1475_v32 = vld [vmem:[#allocation9] sm:$0xff] }
 0xc1f   :  { %v1099_v38 = vpop.eup %1098 }
 0xc20   :  { %v679_v39 = vadd.f32 1.0, %v1099_v38 }
 0xc22   :  { %1100 = vrcp.f32 %v679_v39  ;;  %v691_v1 = vand.u32 2147483648, %v679_v39  ;;  %vm685_vm3 = vweird.f32 %v679_v39  ;;  %v689_v45 = vand.u32 2147483647, %v679_v39 }
 0xc24   :  { %v692_v46 = vor.u32 1.1754944e-38, %v691_v1  ;;  %vm690_vm5 = vcmp.eq.f32.partialorder %v689_v45, 8.507059e+37 }
 0xc28   :  { %v1101_v40 = vpop.eup %1100 }
 0xc29   :  { %v681_v41 = vmul.f32 %v1101_v40, %v679_v39  ;;  %vm686_vm15 = vweird.f32 %v1101_v40 }
 0xc2a   :  { %vm687_vm4 = vmor %vm685_vm3, %vm686_vm15  ;;  %vm1035_vm15 = vcmp.gt.s32.totalorder %v1347_v33, 6 }
 0xc2b   :  { %v682_v42 = vsub.f32 1.0, %v681_v41  ;;  %v1469_v41 = vld [vmem:[#allocation9 + $0x10] sm:$0xff] }
 0xc2d   :  { %v683_v43 = vmul.f32 %v1101_v40, %v682_v42 }
 0xc2f   :  { %v684_v44 = vadd.f32 %v1101_v40, %v683_v43 }
 0xc31   :  { %v688_v2 = vsel %vm687_vm4, %v1101_v40, %v684_v44  ;;  %v1465_v40 = vld [vmem:[#allocation9 + $0x18] sm:$0xff] }
 0xc32   :  { %v693_v4 = vsel %vm690_vm5, %v692_v46, %v688_v2  ;;  %294 = vmatpush.msra.mxu3 %v1465_v40  ;;  %181 = vmatpush.msra.mxu1 %v1465_v40 }
 0xc33   :  { %v696_v49 = vmul.f32 %v693_v4, %v647_v48 }
 0xc34   :  { %295 = vmatpush.msra.mxu3 %v1469_v41  ;;  %182 = vmatpush.msra.mxu1 %v1469_v41 }
 0xc36   :  { %296 = vmatpush.msra.mxu3 %v1471_v0  ;;  %183 = vmatpush.msra.mxu1 %v1471_v0 }
 0xc38   :  { %297 = vmatpush.msra.mxu3 %v1475_v32  ;;  %184 = vmatpush.msra.mxu1 %v1475_v32 }
 0xc3a   :  { %404 = vmatpush.msrb.mxu1 %v1465_v40  ;;  %514 = vmatpush.msrb.mxu3 %v1465_v40 }
 0xc3c   :  { %405 = vmatpush.msrb.mxu1 %v1469_v41  ;;  %515 = vmatpush.msrb.mxu3 %v1469_v41 }
 0xc3e   :  { %406 = vmatpush.msrb.mxu1 %v1471_v0  ;;  %516 = vmatpush.msrb.mxu3 %v1471_v0 }
 0xc40   :  { %407 = vmatpush.msrb.mxu1 %v1475_v32  ;;  %517 = vmatpush.msrb.mxu3 %v1475_v32 }
 0xc78   :  { %v699_v3 = vpop.permute.xlu2 %698 }
 0xc79   :  { %v701_v47 = vmul.f32 %v699_v3, %v693_v4 }
 0xc7b   :  { %703 = vrot.lane.b32.xlu0 %v701_v47, %s1258_s30 }
 0xced   :  { %v704_v50 = vpop.permute.xlu0 %703 }
 0xcee   :  { %v706_v51 = vadd.f32 %v704_v50, %v696_v49 }
 0xcf0   :  { %1102 = vtanh.f32 %v706_v51  ;;  %v1438_v18 = vsel %vm1031_vm7, %v706_v51, %v647_v48  ;;  %v160_v51 = vsel %vm1011_vm6, %v1349_v36, 0.0  ;;  %vm189_vm6 = vcmask 1041408  }
 0xcf6   :  { %v1103_v52 = vpop.eup %1102 }
 0xcf7   :  { %709 = vrot.lane.b32.xlu1 %v1103_v52, %s1262_s3 }
 0xd69   :  { %v710_v53 = vpop.permute.xlu1 %709 }
 0xd6a   :  { %v1426_v54 = vmul.f32 %v710_v53, %v693_v4 }
 0xd6c   :  { %v756_v55 = vsel %vm1031_vm7, %v1426_v54, %v646_v28  ;;  %v869_v28 = vld [vmem:[#allocation4 + $0xe] sm:$0x3]  ;;  %v716_v52 = vsel %vm1031_vm7, %v1426_v54, 0.0 }
 0xd6d   :  { %761 = vrot.lane.b32.xlu2 %v756_v55, %s1258_s30 }
 0xdc7   :  { %v762_v56 = vpop.permute.xlu2 %761 }
 0xdc8   :  { %1033 = vmatmul.msk.f32.vlgmr.msrb.gmra.mxu0 %vm92_vm1, %v762_v56 }
 0xe45   :  { %v782_v59 = vpop.f32.mrf.mxu0 }
 0xe46   :  { %v785_v60 = vadd.f32 %v782_v59, %v759_v57 }
 0xe48   :  { %1104 = vtanh.f32 %v785_v60  ;;  %v1034_v62 = vmul.f32 -1.442695, %v785_v60 }
 0xe4a   :  { %1106 = vpow2.f32 %v1034_v62  ;;  %v606_v62 = vsel %vm1027_vm14, %v1413_v27, 0.0 }
 0xe4e   :  { %v1105_v61 = vpop.eup %1104 }
 0xe4f   :  { %808 = vrot.lane.b32.xlu0 %v1105_v61, %s1262_s3  ;;  %v496_v61 = vsel %vm1023_vm8, %v1400_v58, 0.0  ;;  %v1539_v58 = vld [vmem:[%s1603_s4] ss:$0 sm:$0xff]  ;;  %vm1039_vm8 = vcmp.gt.s32.totalorder %v1347_v33, 7  ;;  %s1265_s4 = smov [#allocation10]  }
 0xe50   :  { %v1107_v63 = vpop.eup %1106  ;;  %s993_s14 = sshll.u32 %s1265_s4, 4  ;;  %s994_s14 = int_to_ptr.vmem [resolvable:$true] %s993_s14 }
 0xe51   :  { %v789_v5 = vadd.f32 1.0, %v1107_v63 }
 0xe53   :  { %1108 = vrcp.f32 %v789_v5  ;;  %v801_v11 = vand.u32 2147483648, %v789_v5  ;;  %vm795_vm10 = vweird.f32 %v789_v5  ;;  %v799_v12 = vand.u32 2147483647, %v789_v5 }
 0xe55   :  { %v802_v14 = vor.u32 1.1754944e-38, %v801_v11  ;;  %vm800_vm13 = vcmp.eq.f32.partialorder %v799_v12, 8.507059e+37 }
 0xe59   :  { %v1109_v6 = vpop.eup %1108 }
 0xe5a   :  { %v791_v7 = vmul.f32 %v1109_v6, %v789_v5  ;;  %vm796_vm9 = vweird.f32 %v1109_v6 }
 0xe5b   :  { %vm797_vm12 = vmor %vm795_vm10, %vm796_vm9 }
 0xe5c   :  { %v792_v8 = vsub.f32 1.0, %v791_v7 }
 0xe5e   :  { %v793_v9 = vmul.f32 %v1109_v6, %v792_v8 }
 0xe60   :  { %v794_v10 = vadd.f32 %v1109_v6, %v793_v9 }
 0xe62   :  { %v798_v13 = vsel %vm797_vm12, %v1109_v6, %v794_v10 }
 0xe63   :  { %v803_v16 = vsel %vm800_vm13, %v802_v14, %v798_v13 }
 0xe64   :  { %v806_v19 = vmul.f32 %v803_v16, %v1438_v18 }
 0xec1   :  { %v809_v15 = vpop.permute.xlu0 %808 }
 0xec2   :  { %v811_v17 = vmul.f32 %v809_v15, %v803_v16 }
 0xec4   :  { %813 = vrot.lane.b32.xlu1 %v811_v17, %s1258_s30 }
 0xf36   :  { %v814_v20 = vpop.permute.xlu1 %813 }
 0xf37   :  { %v1441_v21 = vadd.f32 %v814_v20, %v806_v19 }
 0xf39   :  { %1110 = vtanh.f32 %v1441_v21  ;;  %v1511_v53 = vsel %vm1035_vm15, %v1441_v21, %v1438_v18 }
 0xf3f   :  { %v1111_v22 = vpop.eup %1110 }
 0xf40   :  { %819 = vrot.lane.b32.xlu2 %v1111_v22, %s1262_s3 }
 0xf9a   :  { %v820_v23 = vpop.permute.xlu2 %819 }
 0xf9b   :  { %v1445_v24 = vmul.f32 %v820_v23, %v803_v16 }
 0xf9d   :  { %v1451_v25 = vsel %vm1035_vm15, %v1445_v24, %v756_v55  ;;  %v826_v36 = vsel %vm1035_vm15, %v1445_v24, 0.0 }
 0xf9e   :  { %871 = vrot.lane.b32.xlu0 %v1451_v25, %s1258_s30 }
0x1010   :  { %v872_v26 = vpop.permute.xlu0 %871 }
0x1011   :  { %1037 = vmatmul.msk.f32.vlgmr.msrb.gmra.mxu2 %vm92_vm1, %v872_v26 }
0x1094   :  { %v892_v29 = vpop.f32.mrf.mxu2 }
0x1095   :  { %v895_v30 = vadd.f32 %v892_v29, %v869_v28 }
0x1097   :  { %1112 = vtanh.f32 %v895_v30  ;;  %v1038_v37 = vmul.f32 -1.442695, %v895_v30 }
0x1099   :  { %1114 = vpow2.f32 %v1038_v37 }
0x109d   :  { %v1113_v31 = vpop.eup %1112 }
0x109e   :  { %918 = vrot.lane.b32.xlu1 %v1113_v31, %s1262_s3 }
0x109f   :  { %v1115_v38 = vpop.eup %1114 }
0x10a0   :  { %v899_v39 = vadd.f32 1.0, %v1115_v38 }
0x10a2   :  { %1116 = vrcp.f32 %v899_v39  ;;  %v911_v2 = vand.u32 2147483648, %v899_v39  ;;  %vm905_vm2 = vweird.f32 %v899_v39  ;;  %v909_v46 = vand.u32 2147483647, %v899_v39 }
0x10a4   :  { %v912_v4 = vor.u32 1.1754944e-38, %v911_v2  ;;  %vm910_vm4 = vcmp.eq.f32.partialorder %v909_v46, 8.507059e+37 }
0x10a6   :  { %278 = vrot.lane.b32.xlu1 %v276_v34, %s1258_s30 }
0x10a8   :  { %v1117_v42 = vpop.eup %1116 }
0x10a9   :  { %v901_v43 = vmul.f32 %v1117_v42, %v899_v39  ;;  %vm906_vm11 = vweird.f32 %v1117_v42 }
0x10aa   :  { %vm907_vm3 = vmor %vm905_vm2, %vm906_vm11 }
0x10ab   :  { %v902_v44 = vsub.f32 1.0, %v901_v43 }
0x10ad   :  { %v903_v1 = vmul.f32 %v1117_v42, %v902_v44 }
0x10ae   :  { %388 = vrot.lane.b32.xlu1 %v386_v35, %s1258_s30 }
0x10af   :  { %v904_v45 = vadd.f32 %v1117_v42, %v903_v1 }
0x10b1   :  { %v908_v3 = vsel %vm907_vm3, %v1117_v42, %v904_v45 }
0x10b2   :  { %v913_v48 = vsel %vm910_vm4, %v912_v4, %v908_v3 }
0x10b3   :  { %v916_v55 = vmul.f32 %v913_v48, %v1511_v53 }
0x1110   :  { %v919_v47 = vpop.permute.xlu1 %918 }
0x1111   :  { %v921_v49 = vmul.f32 %v919_v47, %v913_v48 }
0x1113   :  { %923 = vrot.lane.b32.xlu2 %v921_v49, %s1258_s30 }
0x1118   :  { %v279_v50 = vpop.permute.xlu1 %278 }
0x1119   :  { %1016 = vmatmul.msk.f32.vlgmr.msra.gmra.mxu3 %vm92_vm1, %v279_v50 }
0x111a   :  { %734 = vmatpush.msra.mxu3 %v1465_v40 }
0x111b   :  { %165 = vrot.lane.b32.xlu2 %v160_v51, %s1258_s30 }
0x111c   :  { %735 = vmatpush.msra.mxu3 %v1469_v41 }
0x111e   :  { %736 = vmatpush.msra.mxu3 %v1471_v0 }
0x1120   :  { %737 = vmatpush.msra.mxu3 %v1475_v32  ;;  %v389_v60 = vpop.permute.xlu1 %388 }
0x1123   :  { %718 = vrot.lane.b32.xlu2 %v716_v52, %s1258_s30 }
0x112b   :  { %828 = vrot.lane.b32.xlu2 %v826_v36, %s1258_s30 }
0x116d   :  { %v924_v56 = vpop.permute.xlu2 %923 }
0x116e   :  { %v1514_v57 = vadd.f32 %v924_v56, %v916_v55 }
0x1170   :  { %1118 = vtanh.f32 %v1514_v57 }
0x1175   :  { %v166_v54 = vpop.permute.xlu2 %165 }
0x1176   :  { %v1119_v59 = vpop.eup %1118  ;;  %1012 = vmatmul.msk.f32.vlgmr.msra.gmra.mxu1 %vm92_vm1, %v166_v54 }
0x1177   :  { %929 = vrot.lane.b32.xlu0 %v1119_v59, %s1262_s3  ;;  %624 = vmatpush.msra.mxu1 %v1465_v40 }
0x1179   :  { %625 = vmatpush.msra.mxu1 %v1469_v41 }
0x117b   :  { %626 = vmatpush.msra.mxu1 %v1471_v0 }
0x117d   :  { %627 = vmatpush.msra.mxu1 %v1475_v32  ;;  %v719_v13 = vpop.permute.xlu2 %718 }
0x117e   :  { %1020 = vmatmul.msk.f32.vlgmr.msrb.gmra.mxu1 %vm92_vm1, %v389_v60 }
0x117f   :  { %498 = vrot.lane.b32.xlu0 %v496_v61, %s1258_s30  ;;  %844 = vmatpush.msrb.mxu1 %v1465_v40 }
0x1181   :  { %845 = vmatpush.msrb.mxu1 %v1469_v41 }
0x1183   :  { %846 = vmatpush.msrb.mxu1 %v1471_v0 }
0x1185   :  { %847 = vmatpush.msrb.mxu1 %v1475_v32  ;;  %v829_v18 = vpop.permute.xlu2 %828 }
0x1187   :  { %608 = vrot.lane.b32.xlu0 %v606_v62, %s1258_s30 }
0x119c   :  { %v299_v63 = vpop.f32.mrf.mxu3 }
0x119d   :  { %v300_v5 = vadd.f32 %v1539_v58, %v299_v63 }
0x119f   :  { %v302_v6 = vsel %vm189_vm6, %v300_v5, -inf }
0x11a0   :  { %303 = vmax.xlane.f32.xlu2 %v302_v6 }
0x11e9   :  { %v930_v7 = vpop.permute.xlu0 %929 }
0x11ea   :  { %v1543_v8 = vmul.f32 %v930_v7, %v913_v48 }
0x11ec   :  { %v936_v27 = vsel %vm1039_vm8, %v1543_v8, 0.0 }
0x11ed   :  { %938 = vrot.lane.b32.xlu1 %v936_v27, %s1258_s30 }
0x11f1   :  { %v499_v9 = vpop.permute.xlu0 %498 }
0x11f2   :  { %1024 = vmatmul.msk.f32.vlgmr.msrb.gmra.mxu3 %vm92_vm1, %v499_v9 }
0x11f3   :  { %v186_v10 = vpop.f32.mrf.mxu1  ;;  %954 = vmatpush.msrb.mxu3 %v1465_v40 }
0x11f4   :  { %v187_v11 = vadd.f32 %v1539_v58, %v186_v10 }
0x11f5   :  { %955 = vmatpush.msrb.mxu3 %v1469_v41 }
0x11f6   :  { %v190_v12 = vsel %vm189_vm6, %v187_v11, -inf }
0x11f7   :  { %191 = vmax.xlane.f32.xlu0 %v190_v12  ;;  %956 = vmatpush.msrb.mxu3 %v1471_v0 }
0x11f9   :  { %v609_v14 = vpop.permute.xlu0 %608  ;;  %957 = vmatpush.msrb.mxu3 %v1475_v32 }
0x11fa   :  { %1028 = vmatmul.msk.f32.vlgmr.msra.gmra.mxu1 %vm92_vm1, %v609_v14  ;;  %1032 = vmatmul.msk.f32.vlgmr.msra.gmra.mxu3 %vm92_vm1, %v719_v13 }
0x11fb   :  { %v409_v15 = vpop.f32.mrf.mxu1 }
0x11fc   :  { %v410_v16 = vadd.f32 %v1539_v58, %v409_v15 }
0x11fe   :  { %v412_v17 = vsel %vm189_vm6, %v410_v16, -inf }
0x11ff   :  { %413 = vmax.xlane.f32.xlu0 %v412_v17 }
0x1202   :  { %1036 = vmatmul.msk.f32.vlgmr.msrb.gmra.mxu1 %vm92_vm1, %v829_v18 }
0x1213   :  { %v304_v19 = vpop.xlane.xlu2 %303 }
0x1214   :  { %v305_v20 = vsub.f32 %v300_v5, %v304_v19 }
0x1216   :  { %v306_v21 = vmul.f32 1.442695, %v305_v20 }
0x1218   :  { %1120 = vpow2.f32 %v306_v21 }
0x121e   :  { %v1121_v22 = vpop.eup %1120 }
0x121f   :  { %v308_v23 = vsel %vm189_vm6, %v1121_v22, 0.0 }
0x1220   :  { %309 = vadd.xlane.f32.xlu2 %v308_v23 }
0x125f   :  { %v939_v24 = vpop.permute.xlu1 %938 }
0x1260   :  { %1040 = vmatmul.msk.f32.vlgmr.msrb.gmra.mxu3 %vm92_vm1, %v939_v24 }
0x126a   :  { %v192_v26 = vpop.xlane.xlu0 %191 }
0x126b   :  { %v193_v28 = vsub.f32 %v187_v11, %v192_v26 }
0x126d   :  { %v194_v29 = vmul.f32 1.442695, %v193_v28 }
0x126f   :  { %1122 = vpow2.f32 %v194_v29 }
0x1272   :  { %v414_v30 = vpop.xlane.xlu0 %413 }
0x1273   :  { %v415_v31 = vsub.f32 %v410_v16, %v414_v30 }
0x1275   :  { %v1123_v34 = vpop.eup %1122  ;;  %v416_v35 = vmul.f32 1.442695, %v415_v31  ;;  %v519_v37 = vpop.f32.mrf.mxu3 }
0x1276   :  { %v520_v38 = vadd.f32 %v1539_v58, %v519_v37  ;;  %v196_v39 = vsel %vm189_vm6, %v1123_v34, 0.0  ;;  %v977_v37 = vsel %vm1039_vm8, %v1514_v57, %v1511_v53 }
0x1277   :  { %1124 = vpow2.f32 %v416_v35  ;;  %197 = vadd.xlane.f32.xlu1 %v196_v39  ;;  %v629_v32 = vpop.f32.mrf.mxu1 }
0x1278   :  { %v522_v40 = vsel %vm189_vm6, %v520_v38, -inf  ;;  %v630_v42 = vadd.f32 %v1539_v58, %v629_v32 }
0x1279   :  { %523 = vmax.xlane.f32.xlu2 %v522_v40 }
0x127a   :  { %v632_v43 = vsel %vm189_vm6, %v630_v42, -inf }
0x127d   :  { %v1125_v41 = vpop.eup %1124  ;;  %v739_v56 = vpop.f32.mrf.mxu3 }
0x127e   :  { %v418_v0 = vsel %vm189_vm6, %v1125_v41, 0.0  ;;  %v740_v61 = vadd.f32 %v1539_v58, %v739_v56 }
0x127f   :  { %419 = vadd.xlane.f32.xlu1 %v418_v0  ;;  %v849_v27 = vpop.f32.mrf.mxu1 }
0x1280   :  { %v742_v5 = vsel %vm189_vm6, %v740_v61, -inf  ;;  %v850_v9 = vadd.f32 %v1539_v58, %v849_v27 }
0x1282   :  { %v852_v10 = vsel %vm189_vm6, %v850_v9, -inf }
0x1287   :  { %633 = vmax.xlane.f32.xlu1 %v632_v43 }
0x1293   :  { %v310_v44 = vpop.xlane.xlu2 %309 }
0x1294   :  { %1126 = vlog2.f32 %v310_v44 }
0x129a   :  { %v1127_v1 = vpop.eup %1126 }
0x129b   :  { %v312_v45 = vmul.f32 0.6931472, %v1127_v1 }
0x129d   :  { %v313_v2 = vsub.f32 %v305_v20, %v312_v45 }
0x129f   :  { %315 = vst [vmem:[#allocation10 + $0x2] sm:$0x3] %v313_v2 }
0x12e3   :  { %v959_v22 = vpop.f32.mrf.mxu3 }
0x12ea   :  { %v198_v46 = vpop.xlane.xlu1 %197 }
0x12eb   :  { %1128 = vlog2.f32 %v198_v46 }
0x12ec   :  { %v524_v3 = vpop.xlane.xlu2 %523 }
0x12ed   :  { %v525_v4 = vsub.f32 %v520_v38, %v524_v3 }
0x12ef   :  { %v526_v47 = vmul.f32 1.442695, %v525_v4 }
0x12f1   :  { %v1129_v48 = vpop.eup %1128  ;;  %1130 = vpow2.f32 %v526_v47 }
0x12f2   :  { %v200_v49 = vmul.f32 0.6931472, %v1129_v48  ;;  %v420_v50 = vpop.xlane.xlu1 %419 }
0x12f3   :  { %1132 = vlog2.f32 %v420_v50 }
0x12f4   :  { %v201_v51 = vsub.f32 %v193_v28, %v200_v49  ;;  %v960_v28 = vadd.f32 %v1539_v58, %v959_v22  ;;  %v976_v58 = vsel %vm1039_vm8, %v1543_v8, %v1451_v25 }
0x12f6   :  { %202 = vst [vmem:[#allocation10] sm:$0x3] %v201_v51 }
0x12f7   :  { %v1131_v52 = vpop.eup %1130 }
0x12f8   :  { %v528_v36 = vsel %vm189_vm6, %v1131_v52, 0.0 }
0x12f9   :  { %v1133_v55 = vpop.eup %1132  ;;  %529 = vadd.xlane.f32.xlu0 %v528_v36 }
0x12fa   :  { %v422_v54 = vmul.f32 0.6931472, %v1133_v55  ;;  %v634_v59 = vpop.xlane.xlu1 %633 }
0x12fb   :  { %v635_v60 = vsub.f32 %v630_v42, %v634_v59 }
0x12fc   :  { %v423_v62 = vsub.f32 %v415_v31, %v422_v54  ;;  %v962_v31 = vsel %vm189_vm6, %v960_v28, -inf }
0x12fd   :  { %v636_v63 = vmul.f32 1.442695, %v635_v60 }
0x12fe   :  { %425 = vst [vmem:[#allocation10 + $0x4] sm:$0x3] %v423_v62 }
0x12ff   :  { %1134 = vpow2.f32 %v636_v63 }
0x1301   :  { %743 = vmax.xlane.f32.xlu0 %v742_v5 }
0x1305   :  { %v1135_v6 = vpop.eup %1134 }
0x1306   :  { %v638_v7 = vsel %vm189_vm6, %v1135_v6, 0.0 }
0x1307   :  { %639 = vadd.xlane.f32.xlu2 %v638_v7 }
0x130f   :  { %853 = vmax.xlane.f32.xlu2 %v852_v10 }
0x136c   :  { %v530_v11 = vpop.xlane.xlu0 %529 }
0x136d   :  { %1136 = vlog2.f32 %v530_v11 }
0x1373   :  { %v1137_v12 = vpop.eup %1136 }
0x1374   :  { %v532_v13 = vmul.f32 0.6931472, %v1137_v12  ;;  %v744_v14 = vpop.xlane.xlu0 %743 }
0x1375   :  { %v745_v15 = vsub.f32 %v740_v61, %v744_v14 }
0x1376   :  { %v533_v16 = vsub.f32 %v525_v4, %v532_v13 }
0x1377   :  { %v746_v17 = vmul.f32 1.442695, %v745_v15 }
0x1378   :  { %535 = vst [vmem:[#allocation10 + $0x6] sm:$0x3] %v533_v16 }
0x1379   :  { %1138 = vpow2.f32 %v746_v17 }
0x137a   :  { %v640_v18 = vpop.xlane.xlu2 %639 }
0x137b   :  { %1140 = vlog2.f32 %v640_v18 }
0x137f   :  { %v1139_v19 = vpop.eup %1138 }
0x1380   :  { %v748_v20 = vsel %vm189_vm6, %v1139_v19, 0.0 }
0x1381   :  { %v1141_v21 = vpop.eup %1140  ;;  %749 = vadd.xlane.f32.xlu1 %v748_v20 }
0x1382   :  { %v642_v23 = vmul.f32 0.6931472, %v1141_v21  ;;  %v854_v24 = vpop.xlane.xlu2 %853 }
0x1383   :  { %v855_v26 = vsub.f32 %v850_v9, %v854_v24 }
0x1384   :  { %v643_v29 = vsub.f32 %v635_v60, %v642_v23 }
0x1385   :  { %v856_v30 = vmul.f32 1.442695, %v855_v26 }
0x1386   :  { %645 = vst [vmem:[#allocation10 + $0x8] sm:$0x3] %v643_v29 }
0x1387   :  { %1142 = vpow2.f32 %v856_v30 }
0x1389   :  { %963 = vmax.xlane.f32.xlu1 %v962_v31 }
0x138d   :  { %v1143_v34 = vpop.eup %1142 }
0x138e   :  { %v858_v35 = vsel %vm189_vm6, %v1143_v34, 0.0 }
0x138f   :  { %859 = vadd.xlane.f32.xlu0 %v858_v35 }
0x13a2   :  { %985 = vrot.lane.b32.xlu1 %v977_v37, %s1264_s0 }
0x13a3   :  { %979 = vrot.lane.b32.xlu0 %v976_v58, %s1258_s30 }
0x13f4   :  { %v750_v38 = vpop.xlane.xlu1 %749 }
0x13f5   :  { %1144 = vlog2.f32 %v750_v38 }
0x13fb   :  { %v1145_v39 = vpop.eup %1144 }
0x13fc   :  { %v752_v40 = vmul.f32 0.6931472, %v1145_v39  ;;  %v964_v41 = vpop.xlane.xlu1 %963 }
0x13fd   :  { %v965_v0 = vsub.f32 %v960_v28, %v964_v41 }
0x13fe   :  { %v753_v32 = vsub.f32 %v745_v15, %v752_v40 }
0x13ff   :  { %v966_v42 = vmul.f32 1.442695, %v965_v0 }
0x1400   :  { %755 = vst [vmem:[#allocation10 + $0xa] sm:$0x3] %v753_v32 }
0x1401   :  { %1146 = vpow2.f32 %v966_v42 }
0x1402   :  { %v860_v53 = vpop.xlane.xlu0 %859 }
0x1403   :  { %1148 = vlog2.f32 %v860_v53 }
0x1407   :  { %v1147_v57 = vpop.eup %1146 }
0x1408   :  { %v968_v43 = vsel %vm189_vm6, %v1147_v57, 0.0 }
0x1409   :  { %v1149_v44 = vpop.eup %1148  ;;  %969 = vadd.xlane.f32.xlu2 %v968_v43 }
0x140a   :  { %v862_v33 = vmul.f32 0.6931472, %v1149_v44 }
0x140c   :  { %v863_v25 = vsub.f32 %v855_v26, %v862_v33 }
0x140e   :  { %865 = vst [vmem:[#allocation10 + $0xc] sm:$0x3] %v863_v25 }
0x1414   :  { %v986_v8 = vpop.permute.xlu1 %985 }
0x1415   :  { %988 = vst.msk [vmem:[#allocation3] sm:$0x3] %vm72_vm0, %v986_v8  ;;  %v980_v1 = vpop.permute.xlu0 %979 }
0x1416   :  { %983 = vst.msk [vmem:[#allocation2] sm:$0x3] %vm72_vm0, %v980_v1 }
0x147c   :  { %v970_v45 = vpop.xlane.xlu2 %969 }
0x147d   :  { %1150 = vlog2.f32 %v970_v45 }
0x1483   :  { %v1151_v2 = vpop.eup %1150 }
0x1484   :  { %v972_v46 = vmul.f32 0.6931472, %v1151_v2 }
0x1486   :  { %v973_v3 = vsub.f32 %v965_v0, %v972_v46 }
0x1488   :  { %975 = vst [vmem:[#allocation10 + $0xe] sm:$0x3] %v973_v3 }
0x1489   :  { %1001 = dma.vmem_to_hbm [thread:$0]  %s994_s14, 256, %s996_s17, [#allocation6], %s1258_s30, %s1258_s30, %s1259_s6  }
0x148a   :  { %1252 = dma.done.wait [#allocation6], 256  }
0x148b   :  { %1253 = vsyncadd [#allocation6], 4294967040 }
0x148c   :  { %1006 = vsyncpa [#allocation5], 1 }
0x148d   :  { %1007 = vsyncpa [#allocation8], 1 }
0x148e   :  { %1008 = vsyncpa [#allocation6], 1 }

</bundles_post_ra>
